<compile_context>
chip_gen: v6e
topology: v6e:2x2x1
jax: 0.10.0
libtpu: 0.0.40
codegen_flags: <defaults>
</compile_context>

<pallas_src>
import numpy as np
import jax
import jax.numpy as jnp
from jax.experimental import pallas as pl
from jax.experimental.pallas import tpu as pltpu

PI = float(np.pi)


def _rf_weighted_average_kernel(
    p_ref, scale_ref, k_ref, nvalid_ref,           # SMEM scalar params
    x_ref, w_ref, b_ref, m_ref, s_ref, resp_ref,   # VMEM tensors
    out_ref,                                       # VMEM (1, 8, 128) per-tile partial loss slab
):
    tile_n = x_ref.shape[0]
    n_items = m_ref.shape[1] // 2                  # I

    # --- process_s_scale (scalar / tiny-vector path) ---
    scale = jnp.maximum(scale_ref[0], 0.0)
    p = jnp.clip(p_ref[0], 0.0, 1.0)
    k = k_ref[0]
    s_relu = jnp.maximum(s_ref[...], 0.0)                              # (1, I)
    # TODO(synk): if every s <= 0 this divides by zero (NaN loss), matching the PyTorch reference.
    s_norm = s_relu / jnp.sum(s_relu, axis=-1, keepdims=True)          # (1, I)

    # --- RF_forward: ONE lane-wide bf16 MXU matmul covering all I ensemble items ---
    logits = jnp.dot(x_ref[...], w_ref[...],
                     preferred_element_type=jnp.float32) + b_ref[...]  # (tile_n, P) f32

    # one row-wise max over the packed lane axis (valid per item: softmax is shift-invariant)
    row_max = jnp.max(logits, axis=-1, keepdims=True)                  # (tile_n, 1)
    e = jnp.exp(logits - row_max)                                      # (tile_n, P)

    # per-item softmax numerators (sum_b e*orient) and denominators (sum_b e) via a
    # single small MXU matmul against the block-diagonal reduction matrix.
    nd = jnp.dot(e, m_ref[...], preferred_element_type=jnp.float32)    # (tile_n, 2I)
    num = nd[:, :n_items]
    den = nd[:, n_items:]
    rf_out = num * pl.reciprocal(den, approx=False)                    # (tile_n, I)

    # s-weighted mean over ensemble items
    weighted_mean = jnp.sum(rf_out * s_norm, axis=-1, keepdims=True)   # (tile_n, 1)

    # --- raw_mean_likelihood + total_log_likelihood (f32) ---
    dist = PI / 4.0 - jnp.abs(weighted_mean - resp_ref[...])           # (tile_n, 1)
    model_likelihood = jax.nn.sigmoid(scale * dist)
    total_likelihood = p * k + (1.0 - p) * model_likelihood
    log_lik = jnp.log(total_likelihood * 0.99 + 0.005)                 # (tile_n, 1)

    # mask the zero-padded rows beyond the true trial count
    row = (pl.program_id(0) * tile_n
           + jax.lax.broadcasted_iota(jnp.int32, (tile_n, 1), 0))
    log_lik = jnp.where(row < nvalid_ref[0], log_lik, 0.0)

    partial = -jnp.sum(log_lik, keepdims=True)                         # (1, 1)
    out_ref[...] = jnp.broadcast_to(partial, out_ref.shape)            # full-lane store


def rf_weighted_average(X_img, resp, W, b, orientations, p, s, scale, k=0.5, *, tile_n=256):
    N = X_img.shape[0]
    I, D, B = W.shape
    X = jnp.asarray(X_img, jnp.float32).reshape(N, -1)                 # NCHW -> (N, D)
    assert X.shape[1] == D

    # --- lane-pack the per-item readouts: (I, D, B) -> (D, I*B), zero-pad lanes to >=128 ---
    IB = I * B
    P = max(128, ((IB + 127) // 128) * 128)
    W_packed = jnp.transpose(jnp.asarray(W, jnp.float32), (1, 0, 2)).reshape(D, IB)
    W_packed = jnp.pad(W_packed, ((0, 0), (0, P - IB))).astype(jnp.bfloat16)
    b_packed = jnp.pad(jnp.asarray(b, jnp.float32).reshape(1, IB), ((0, 0), (0, P - IB)))

    # block-diagonal reduction matrix: cols 0..I-1 -> sum_b e*orient_b, cols I..2I-1 -> sum_b e
    orient = jnp.asarray(orientations, jnp.float32).reshape(B, 1)
    eye = jnp.eye(I, dtype=jnp.float32)
    m_mat = jnp.concatenate(
        [jnp.kron(eye, orient), jnp.kron(eye, jnp.ones((B, 1), jnp.float32))], axis=1)  # (IB, 2I)
    m_mat = jnp.pad(m_mat, ((0, P - IB), (0, 0)))

    # --- tile the trial axis; zero-pad to a multiple of tile_n (masked in-kernel) ---
    num_tiles = (N + tile_n - 1) // tile_n
    n_pad = num_tiles * tile_n
    X_bf = jnp.pad(X, ((0, n_pad - N), (0, 0))).astype(jnp.bfloat16)
    resp_p = jnp.pad(jnp.asarray(resp, jnp.float32).reshape(N, 1), ((0, n_pad - N), (0, 0)))

    smem = pl.BlockSpec(memory_space=pltpu.MemorySpace.SMEM)
    grid_spec = pltpu.PrefetchScalarGridSpec(
        num_scalar_prefetch=0,
        grid=(num_tiles,),
        in_specs=[
            smem, smem, smem, smem,                                  # p, scale, k, n_valid
            pl.BlockSpec((tile_n, D), lambda i: (i, 0)),             # X tile (streamed, double-buffered)
            pl.BlockSpec((D, P), lambda i: (0, 0)),                  # packed weights (VMEM resident)
            pl.BlockSpec((1, P), lambda i: (0, 0)),                  # packed bias
            pl.BlockSpec((P, 2 * I), lambda i: (0, 0)),              # num/den reduction matrix
            pl.BlockSpec((1, I), lambda i: (0, 0)),                  # s
            pl.BlockSpec((tile_n, 1), lambda i: (i, 0)),             # resp tile
        ],
        out_specs=pl.BlockSpec((1, 8, 128), lambda i: (i, 0, 0)),    # per-tile partial loss slab
    )
    partials = pl.pallas_call(
        _rf_weighted_average_kernel,
        out_shape=jax.ShapeDtypeStruct((num_tiles, 8, 128), jnp.float32),
        grid_spec=grid_spec,
        compiler_params=pltpu.CompilerParams(
            dimension_semantics=("parallel",),        # independent tiles -> v7x megacore-shardable
            vmem_limit_bytes=32 * 1024 * 1024),
    )(
        jnp.asarray(p, jnp.float32).reshape(1),
        jnp.asarray(scale, jnp.float32).reshape(1),
        jnp.asarray(k, jnp.float32).reshape(1),
        jnp.asarray(N, jnp.int32).reshape(1),
        X_bf, W_packed, b_packed, m_mat,
        jnp.asarray(s, jnp.float32).reshape(1, I),
        resp_p,
    )
    # tiny final reduction over tiles (done outside the kernel so the grid axis stays parallel)
    return jnp.sum(partials[:, 0, 0])


def _reference(X_img, resp, W, b, orientations, p, s, scale, k=0.5, matmul_dtype=jnp.float32):
    """Pure-JAX mirror of the PyTorch forward (matmul_dtype lets us match the bf16 MXU path)."""
    N = X_img.shape[0]
    Xf = jnp.asarray(X_img, jnp.float32).reshape(N, -1).astype(matmul_dtype)
    Wc = jnp.asarray(W, jnp.float32).astype(matmul_dtype)
    logits = jnp.einsum("nd,idb->nbi", Xf, Wc,
                        preferred_element_type=jnp.float32).astype(jnp.float32)
    logits = logits + jnp.transpose(jnp.asarray(b, jnp.float32), (1, 2, 0))       # (N, B, I)
    rf = jax.nn.softmax(logits, axis=1)
    rf_out = jnp.sum(rf * jnp.asarray(orientations, jnp.float32).reshape(1, -1, 1), axis=1)  # (N, I)
    s_r = jnp.maximum(jnp.asarray(s, jnp.float32), 0.0)
    s_norm = s_r / jnp.sum(s_r)
    scale_r = jnp.maximum(jnp.float32(scale), 0.0)
    wm = rf_out @ s_norm                                                          # (N,)
    dist = PI / 4.0 - jnp.abs(wm - jnp.asarray(resp, jnp.float32))
    ml = jax.nn.sigmoid(scale_r * dist)
    p_c = jnp.clip(jnp.float32(p), 0.0, 1.0)
    tl = p_c * k + (1.0 - p_c) * ml
    return -jnp.sum(jnp.log(tl * 0.99 + 0.005))


if __name__ == "__main__":
    key = jax.random.PRNGKey(0)
    kx, kw, kb, ks, kr = jax.random.split(key, 5)

    N, C, H, Wd = 384, 2, 4, 4     # trials, NCHW image per trial (N exercises grid + padding)
    I, B = 4, 16                   # ensemble items, orientation bins
    D = C * H * Wd

    X_img = jax.random.normal(kx, (N, C, H, Wd), jnp.float32)
    W = 0.1 * jax.random.normal(kw, (I, D, B), jnp.float32)
    b = 0.1 * jax.random.normal(kb, (I, 1, B), jnp.float32)
    orientations = jnp.linspace(0.0, PI, B, endpoint=False, dtype=jnp.float32).reshape(1, B)
    resp = jax.random.uniform(kr, (N,), jnp.float32, 0.0, PI)
    s = jax.random.uniform(ks, (I,), jnp.float32, 0.1, 1.0)
    p, scale, k = 0.3, 5.0, 0.5

    out = rf_weighted_average(X_img, resp, W, b, orientations, p, s, scale, k, tile_n=256)
    out = jax.block_until_ready(out)

    ref_f32 = _reference(X_img, resp, W, b, orientations, p, s, scale, k)
    ref_bf16 = _reference(X_img, resp, W, b, orientations, p, s, scale, k,
                          matmul_dtype=jnp.bfloat16)

    o, r32, rbf = float(out), float(ref_f32), float(ref_bf16)
    assert np.isfinite(o), o
    # tight check against a reference using the same bf16-matmul / f32-accumulate path
    assert abs(o - rbf) <= 1e-3 * abs(rbf) + 1e-2, (o, rbf)
    # loose check against the full-f32 reference (bf16 MXU inputs are the only difference)
    assert abs(o - r32) <= 1e-2 * abs(r32) + 1e-2, (o, r32)

    print("KERNEL_OK")
</pallas_src>

<mosaic_0001>
module attributes {stable_mosaic.version = 11 : i64} {
  func.func @_rf_weighted_average_kernel(%arg0: i32, %arg1: memref<1xf32, #tpu.memory_space<smem>>, %arg2: memref<1xf32, #tpu.memory_space<smem>>, %arg3: memref<1xf32, #tpu.memory_space<smem>>, %arg4: memref<1xi32, #tpu.memory_space<smem>>, %arg5: memref<256x32xbf16, #tpu.memory_space<vmem>>, %arg6: memref<32x128xbf16, #tpu.memory_space<vmem>>, %arg7: memref<1x128xf32, #tpu.memory_space<vmem>>, %arg8: memref<128x8xf32, #tpu.memory_space<vmem>>, %arg9: memref<1x4xf32, #tpu.memory_space<vmem>>, %arg10: memref<256x1xf32, #tpu.memory_space<vmem>>, %arg11: memref<1x8x128xf32, #tpu.memory_space<vmem>>) attributes {dimension_semantics = [#tpu.dimension_semantics<parallel>], iteration_bounds = array<i64: 2>, scalar_prefetch = 0 : i64, scratch_operands = 0 : i64, tpu.core_type = #tpu.core_type<tc>, window_params = [{transform_indices = @transform_0, window_bounds = array<i64: 1>}, {transform_indices = @transform_1, window_bounds = array<i64: 1>}, {transform_indices = @transform_2, window_bounds = array<i64: 1>}, {transform_indices = @transform_3, window_bounds = array<i64: 1>}, {transform_indices = @transform_4, window_bounds = array<i64: 256, 32>}, {pipeline_mode = #tpu.pipeline_mode<synchronous>, transform_indices = @transform_5, window_bounds = array<i64: 32, 128>}, {pipeline_mode = #tpu.pipeline_mode<synchronous>, transform_indices = @transform_6, window_bounds = array<i64: 1, 128>}, {pipeline_mode = #tpu.pipeline_mode<synchronous>, transform_indices = @transform_7, window_bounds = array<i64: 128, 8>}, {pipeline_mode = #tpu.pipeline_mode<synchronous>, transform_indices = @transform_8, window_bounds = array<i64: 1, 4>}, {transform_indices = @transform_9, window_bounds = array<i64: 256, 1>}, {transform_indices = @transform_10, window_bounds = array<i64: 1, 8, 128>}]} {
    %c0 = arith.constant 0 : index
    %0 = memref.load %arg2[%c0] : memref<1xf32, #tpu.memory_space<smem>>
    %cst = arith.constant 0.000000e+00 : f32
    %1 = arith.maximumf %0, %cst : f32
    %c0_0 = arith.constant 0 : index
    %2 = memref.load %arg1[%c0_0] : memref<1xf32, #tpu.memory_space<smem>>
    %cst_1 = arith.constant 0.000000e+00 : f32
    %cst_2 = arith.constant 1.000000e+00 : f32
    %3 = arith.maximumf %cst_1, %2 : f32
    %4 = arith.minimumf %cst_2, %3 : f32
    %c0_3 = arith.constant 0 : index
    %5 = memref.load %arg3[%c0_3] : memref<1xf32, #tpu.memory_space<smem>>
    %c0_4 = arith.constant 0 : index
    %c0_5 = arith.constant 0 : index
    %6 = vector.load %arg9[%c0_4, %c0_5] : memref<1x4xf32, #tpu.memory_space<vmem>>, vector<1x4xf32>
    %cst_6 = arith.constant 0.000000e+00 : f32
    %7 = vector.broadcast %cst_6 : f32 to vector<1x4xf32>
    %8 = arith.maximumf %6, %7 : vector<1x4xf32>
    %cst_7 = arith.constant dense<0.000000e+00> : vector<1xf32>
    %9 = vector.multi_reduction <add>, %8, %cst_7 [1] : vector<1x4xf32> to vector<1xf32>
    %10 = vector.shape_cast %9 : vector<1xf32> to vector<1x1xf32>
    %11 = vector.broadcast %10 : vector<1x1xf32> to vector<1x4xf32>
    %12 = arith.divf %8, %11 : vector<1x4xf32>
    %c0_8 = arith.constant 0 : index
    %c0_9 = arith.constant 0 : index
    %13 = vector.load %arg5[%c0_8, %c0_9] : memref<256x32xbf16, #tpu.memory_space<vmem>>, vector<256x32xbf16>
    %c0_10 = arith.constant 0 : index
    %c0_11 = arith.constant 0 : index
    %14 = vector.load %arg6[%c0_10, %c0_11] : memref<32x128xbf16, #tpu.memory_space<vmem>>, vector<32x128xbf16>
    %cst_12 = arith.constant dense<0.000000e+00> : vector<256x128xf32>
    %15 = tpu.matmul %13, %14, %cst_12 {dimension_numbers = #tpu.dot_dimension_numbers<[1], [0], [0], [1], [0, 0, 1, 1], [], []>} : vector<256x32xbf16>, vector<32x128xbf16>, vector<256x128xf32> -> vector<256x128xf32>
    %c0_13 = arith.constant 0 : index
    %c0_14 = arith.constant 0 : index
    %16 = vector.load %arg7[%c0_13, %c0_14] : memref<1x128xf32, #tpu.memory_space<vmem>>, vector<1x128xf32>
    %17 = vector.broadcast %16 : vector<1x128xf32> to vector<256x128xf32>
    %18 = arith.addf %15, %17 : vector<256x128xf32>
    %cst_15 = arith.constant dense<0xFF800000> : vector<256xf32>
    %19 = vector.multi_reduction <maximumf>, %18, %cst_15 [1] : vector<256x128xf32> to vector<256xf32>
    %20 = vector.shape_cast %19 : vector<256xf32> to vector<256x1xf32>
    %21 = vector.broadcast %20 : vector<256x1xf32> to vector<256x128xf32>
    %22 = arith.subf %18, %21 : vector<256x128xf32>
    %23 = math.exp %22 : vector<256x128xf32>
    %c0_16 = arith.constant 0 : index
    %c0_17 = arith.constant 0 : index
    %24 = vector.load %arg8[%c0_16, %c0_17] : memref<128x8xf32, #tpu.memory_space<vmem>>, vector<128x8xf32>
    %cst_18 = arith.constant dense<0.000000e+00> : vector<256x8xf32>
    %25 = tpu.matmul %23, %24, %cst_18 {dimension_numbers = #tpu.dot_dimension_numbers<[1], [0], [0], [1], [0, 0, 1, 1], [], []>} : vector<256x128xf32>, vector<128x8xf32>, vector<256x8xf32> -> vector<256x8xf32>
    %26 = vector.extract_strided_slice %25 {offsets = [0, 0], sizes = [256, 4], strides = [1, 1]} : vector<256x8xf32> to vector<256x4xf32>
    %27 = vector.extract_strided_slice %25 {offsets = [0, 4], sizes = [256, 4], strides = [1, 1]} : vector<256x8xf32> to vector<256x4xf32>
    %28 = tpu.reciprocal %27 : vector<256x4xf32> -> vector<256x4xf32>
    %29 = arith.mulf %26, %28 : vector<256x4xf32>
    %30 = vector.broadcast %12 : vector<1x4xf32> to vector<256x4xf32>
    %31 = arith.mulf %29, %30 : vector<256x4xf32>
    %cst_19 = arith.constant dense<0.000000e+00> : vector<256xf32>
    %32 = vector.multi_reduction <add>, %31, %cst_19 [1] : vector<256x4xf32> to vector<256xf32>
    %33 = vector.shape_cast %32 : vector<256xf32> to vector<256x1xf32>
    %c0_20 = arith.constant 0 : index
    %c0_21 = arith.constant 0 : index
    %34 = vector.load %arg10[%c0_20, %c0_21] : memref<256x1xf32, #tpu.memory_space<vmem>>, vector<256x1xf32>
    %35 = arith.subf %33, %34 : vector<256x1xf32>
    %36 = math.absf %35 : vector<256x1xf32>
    %cst_22 = arith.constant 0.785398185 : f32
    %37 = vector.broadcast %cst_22 : f32 to vector<256x1xf32>
    %38 = arith.subf %37, %36 : vector<256x1xf32>
    %39 = vector.broadcast %1 : f32 to vector<256x1xf32>
    %40 = arith.mulf %39, %38 : vector<256x1xf32>
    %41 = arith.negf %40 : vector<256x1xf32>
    %42 = math.exp %41 : vector<256x1xf32>
    %cst_23 = arith.constant 1.000000e+00 : f32
    %43 = vector.broadcast %cst_23 : f32 to vector<256x1xf32>
    %44 = arith.addf %43, %42 : vector<256x1xf32>
    %45 = arith.divf %43, %44 : vector<256x1xf32>
    %46 = arith.mulf %4, %5 : f32
    %cst_24 = arith.constant 1.000000e+00 : f32
    %47 = arith.subf %cst_24, %4 : f32
    %48 = vector.broadcast %47 : f32 to vector<256x1xf32>
    %49 = arith.mulf %48, %45 : vector<256x1xf32>
    %50 = vector.broadcast %46 : f32 to vector<256x1xf32>
    %51 = arith.addf %50, %49 : vector<256x1xf32>
    %cst_25 = arith.constant 9.900000e-01 : f32
    %52 = vector.broadcast %cst_25 : f32 to vector<256x1xf32>
    %53 = arith.mulf %51, %52 : vector<256x1xf32>
    %cst_26 = arith.constant 5.000000e-03 : f32
    %54 = vector.broadcast %cst_26 : f32 to vector<256x1xf32>
    %55 = arith.addf %53, %54 : vector<256x1xf32>
    %56 = math.log %55 : vector<256x1xf32>
    %c256_i32 = arith.constant 256 : i32
    %57 = arith.muli %arg0, %c256_i32 : i32
    %58 = tpu.iota {dimensions = array<i32: 0>} : vector<256x1xi32>
    %59 = vector.broadcast %57 : i32 to vector<256x1xi32>
    %60 = arith.addi %59, %58 : vector<256x1xi32>
    %c0_27 = arith.constant 0 : index
    %61 = memref.load %arg4[%c0_27] : memref<1xi32, #tpu.memory_space<smem>>
    %62 = vector.broadcast %61 : i32 to vector<256x1xi32>
    %63 = arith.cmpi slt, %60, %62 : vector<256x1xi32>
    %cst_28 = arith.constant 0.000000e+00 : f32
    %64 = vector.broadcast %cst_28 : f32 to vector<256x1xf32>
    %65 = arith.select %63, %56, %64 : vector<256x1xi1>, vector<256x1xf32>
    %66 = vector.shape_cast %65 : vector<256x1xf32> to vector<1x256x1xf32>
    %cst_29 = arith.constant dense<0.000000e+00> : vector<1xf32>
    %67 = vector.multi_reduction <add>, %66, %cst_29 [1, 2] : vector<1x256x1xf32> to vector<1xf32>
    %68 = vector.shape_cast %67 : vector<1xf32> to vector<1x1x1xf32>
    %69 = vector.extract %68[0, 0, 0] : f32 from vector<1x1x1xf32>
    %70 = vector.broadcast %69 : f32 to vector<1x1xf32>
    %cst_30 = arith.constant 0.000000e+00 : f32
    %71 = vector.broadcast %cst_30 : f32 to vector<1x1xf32>
    %72 = arith.subf %71, %70 : vector<1x1xf32>
    %73 = vector.shape_cast %72 : vector<1x1xf32> to vector<1x1x1xf32>
    %74 = vector.broadcast %73 : vector<1x1x1xf32> to vector<1x8x128xf32>
    %c0_31 = arith.constant 0 : index
    %c0_32 = arith.constant 0 : index
    %c0_33 = arith.constant 0 : index
    %75 = vector.load %arg11[%c0_31, %c0_32, %c0_33] : memref<1x8x128xf32, #tpu.memory_space<vmem>>, vector<1x8x128xf32>
    tpu.vector_store %arg11[%c0_31, %c0_32, %c0_33], %74 {strides = array<i32>} : memref<1x8x128xf32, #tpu.memory_space<vmem>>, vector<1x8x128xf32>,
    return
  }
  func.func @transform_0(%arg0: i32) -> i32 {
    %c0_i32 = arith.constant 0 : i32
    %c0_i32_0 = arith.constant 0 : i32
    return %c0_i32 : i32
  }
  func.func @transform_1(%arg0: i32) -> i32 {
    %c0_i32 = arith.constant 0 : i32
    %c0_i32_0 = arith.constant 0 : i32
    return %c0_i32 : i32
  }
  func.func @transform_2(%arg0: i32) -> i32 {
    %c0_i32 = arith.constant 0 : i32
    %c0_i32_0 = arith.constant 0 : i32
    return %c0_i32 : i32
  }
  func.func @transform_3(%arg0: i32) -> i32 {
    %c0_i32 = arith.constant 0 : i32
    %c0_i32_0 = arith.constant 0 : i32
    return %c0_i32 : i32
  }
  func.func @transform_4(%arg0: i32) -> (i32, i32) {
    %c0_i32 = arith.constant 0 : i32
    %c0_i32_0 = arith.constant 0 : i32
    return %arg0, %c0_i32 : i32, i32
  }
  func.func @transform_5(%arg0: i32) -> (i32, i32) {
    %c0_i32 = arith.constant 0 : i32
    %c0_i32_0 = arith.constant 0 : i32
    %c0_i32_1 = arith.constant 0 : i32
    return %c0_i32, %c0_i32_0 : i32, i32
  }
  func.func @transform_6(%arg0: i32) -> (i32, i32) {
    %c0_i32 = arith.constant 0 : i32
    %c0_i32_0 = arith.constant 0 : i32
    %c0_i32_1 = arith.constant 0 : i32
    return %c0_i32, %c0_i32_0 : i32, i32
  }
  func.func @transform_7(%arg0: i32) -> (i32, i32) {
    %c0_i32 = arith.constant 0 : i32
    %c0_i32_0 = arith.constant 0 : i32
    %c0_i32_1 = arith.constant 0 : i32
    return %c0_i32, %c0_i32_0 : i32, i32
  }
  func.func @transform_8(%arg0: i32) -> (i32, i32) {
    %c0_i32 = arith.constant 0 : i32
    %c0_i32_0 = arith.constant 0 : i32
    %c0_i32_1 = arith.constant 0 : i32
    return %c0_i32, %c0_i32_0 : i32, i32
  }
  func.func @transform_9(%arg0: i32) -> (i32, i32) {
    %c0_i32 = arith.constant 0 : i32
    %c0_i32_0 = arith.constant 0 : i32
    return %arg0, %c0_i32 : i32, i32
  }
  func.func @transform_10(%arg0: i32) -> (i32, i32, i32) {
    %c0_i32 = arith.constant 0 : i32
    %c0_i32_0 = arith.constant 0 : i32
    %c0_i32_1 = arith.constant 0 : i32
    return %arg0, %c0_i32, %c0_i32_0 : i32, i32, i32
  }
}

</mosaic_0001>

<bundles_post_ra>
// kernel: tpu_custom_call.1
= control target key start
LH: loop header
LB: loop body
LE: loop exit
PB: predicated region body
PF: predicated region fallthrough
CT: control target
= control target key end

     0   :  { %s4102_s0 = inlined_call_operand.<no memory space> [shape: f32[1], index: 0, kind: input, shape index: {}]   ;;  %s4103_s1 = inlined_call_operand.<no memory space> [shape: f32[1], index: 1, kind: input, shape index: {}]   ;;  %s4104_s2 = inlined_call_operand.<no memory space> [shape: f32[1], index: 2, kind: input, shape index: {}]   ;;  %s4105_s4 = inlined_call_operand.vmem [shape: bf16[512,32], index: 4, kind: input, shape index: {}]   ;;  %s4106_s5 = inlined_call_operand.vmem [shape: bf16[32,128], index: 5, kind: input, shape index: {}]   ;;  %s4107_s6 = inlined_call_operand.vmem [shape: f32[1,128], index: 6, kind: input, shape index: {}]   ;;  %s4108_s7 = inlined_call_operand.vmem [shape: f32[128,8], index: 7, kind: input, shape index: {}]   ;;  %s4109_s8 = inlined_call_operand.vmem [shape: f32[1,4], index: 8, kind: input, shape index: {}]   ;;  %s4110_s9 = inlined_call_operand.vmem [shape: f32[512,1], index: 9, kind: input, shape index: {}]   ;;  %s4111_s10 = inlined_call_operand.hbm [shape: f32[2,8,128], index: 10, kind: output, shape index: {}]   ;;  %s4112_s3 = inlined_call_operand.<no memory space> [shape: s32[1], index: 3, kind: input, shape index: {}]  }
   0x1   :  { %15 = sst [smem:[#allocation2]] %s4102_s0 }
   0x2   :  { %16 = sst [smem:[#allocation3]] %s4103_s1 }
   0x3   :  { %17 = sst [smem:[#allocation4]] %s4104_s2 }
   0x4   :  { %18 = sst [smem:[#allocation5]] %s4112_s3 }
   0x5   :  { %19 = vsyncpa [#allocation7], 0 }
   0x6   :  { %21 = vsyncpa [#allocation7 + $0x1], 0  ;;  %s3129_s21 = smov 0   ;;  %s3131_s22 = smov 0  }
   0x7   :  { %s3133_s23 = smov 0   ;;  %s3135_s0 = smov 0  }
   0x8 LB: > { %s3150_s1 = sadd.s32 4294967295, %s3056_s0   ;;  %s2317_s2 = sadd.s32 4294967294, %s3056_s0   ;;  %s3056_s0 = sphi %s3135_s0, %s4118_s0   ;;  %s3052_s23 = sphi %s3133_s23, %s4117_s23   ;;  %s3048_s22 = sphi %s3131_s22, %s4116_s22   ;;  %s3044_s21 = sphi %s3129_s21, %s4115_s21  }
   0x9   : > { %s3154_s3 = sadd.s32 1, %s3056_s0   ;;  %s254_s24 = sadd.s32 1, %s3052_s23 }
   0xa   : > { %s251_s25 = ssub.s32 %s3056_s0, %s3154_s3  ;;  %p264_p0 = scmp.ne.s32.totalorder %s3052_s23, %s3048_s22 }
   0xb   : > { %p252_p1 = scmp.eq.s32.totalorder %s251_s25, 0  ;;  %p265_p2 = scmp.eq.s32.totalorder %s3150_s1, 1 }
   0xc   : > { %p270_p3 = scmp.ne.s32.totalorder %s3048_s22, %s3044_s21  ;;  %p271_p4 = scmp.eq.s32.totalorder %s2317_s2, 1 }
   0xd   : > { %s3165_s26 = scalar_select %p252_p1, %s3052_s23, %s254_s24  }
   0xe   : > { %p3167_p5 = por %p265_p2, %p264_p0  ;;  %p3171_p6 = por %p271_p4, %p270_p3 }
   0xf   : > { %p2320_p7 = scmp.ge.s32.totalorder %s3056_s0, 1  ;;  %p331_p8 = scmp.lt.s32.totalorder %s3056_s0, 3 }
  0x11   : > { %p332_p9 = pnand %p2320_p7, %p331_p8 }
  0x12   : > { %s2322_s11 = sshll.u32 (!%p332_p9), %s3150_s1, 5  ;;  %s3058_s12 = smov (!%p332_p9), 124  }
  0x13   : > { %335 = sbr.rel (%p332_p9) target bundleno = 1260 (0x4ec), region = 60  ;;  %p375_p10 = scmp.lt.s32.totalorder (!%p332_p9), %s2322_s11, 63 }
  0x14   : > { %s3059_s18 = smov (!%p332_p9), 0.0   ;;  %s3689_s20 = sld [smem:[#allocation4]] (!%p332_p9) }
  0x15   : > { %s2090_s24 = sld [smem:[#allocation5]] (!%p332_p9)  ;;  %s2393_s25 = sshll.u32 (!%p332_p9), %s3150_s1, 8 }
  0x16   : > { %s3060_s29 = smov (!%p332_p9), 1.0   ;;  %s2395_s16 = sshll.u32 (!%p332_p9), %s3150_s1, 7 }
  0x18   : > { %v2656_v0 = vld [vmem:[%s4106_s5 + $0x8] sm:$0xff]   ;;  %v2657_v1 = vld [vmem:[%s4106_s5] sm:$0xff]   ;;  %s4120_s11 = smov (!%p375_p10, %s2322_s11), 63  ;;  %vm536_vm0 = vcmask 261120   ;;  %v921_v18 = vld [vmem:[%s4108_s7 + $0x78] sm:$0xff]  ;;  %vm395_vm1 = vcmask 24576  }
  0x19   : > { %2464 = vmatprep.subr.bf16.mxu0 %v2656_v0  ;;  %s2323_s14 = sshll.u32 %s4120_s11, 2  ;;  %v920_v19 = vld [vmem:[%s4108_s7 + $0x70] sm:$0xff]  ;;  %2580 = vmatprep.subr.mxu1 %v921_v18  ;;  %v919_v20 = vld [vmem:[%s4108_s7 + $0x68] sm:$0xff]  ;;  %v918_v21 = vld [vmem:[%s4108_s7 + $0x60] sm:$0xff]  ;;  %vm1377_vm2 = vcmask 31744   ;;  %s2325_s13 = sshll.u32 %s4120_s11, 3 }
  0x1a   : > { %2465 = vmatpush3.bf16.msra.mxu0 %v2656_v0  ;;  %s3190_s17 = scalar_lea.vmem %s4105_s4, %s2323_s14  ;;  %2596 = vmatpush3.msra.mxu1 %v921_v18  ;;  %v917_v22 = vld [vmem:[%s4108_s7 + $0x58] sm:$0xff]  ;;  %v916_v23 = vld [vmem:[%s4108_s7 + $0x50] sm:$0xff]  ;;  %v915_v24 = vld [vmem:[%s4108_s7 + $0x48] sm:$0xff]  ;;  %s387_s14 = sld [smem:[#allocation3]]  ;;  %vm2156_vm5 = vcmask 7168  }
  0x1b   : > { %2466 = vmatprep.subr.bf16.mxu0 %v2657_v1  ;;  %v2658_v2 = vld [vmem:[%s3190_s17] sm:$0xff]   ;;  %v2659_v3 = vld [vmem:[%s3190_s17 + $0x8] sm:$0xff]   ;;  %v2660_v4 = vld [vmem:[%s3190_s17 + $0x10] sm:$0xff]   ;;  %2581 = vmatprep.subr.mxu1 %v920_v19  ;;  %s389_s11 = sld [smem:[#allocation2]] }
  0x1c   : > { %2468 = vmatprep.mubr.msk.bf16.mxu0 %vm536_vm0, %v2658_v2  ;;  %v2661_v5 = vld [vmem:[%s3190_s17 + $0x18] sm:$0xff]   ;;  %v2662_v6 = vld [vmem:[%s3190_s17 + $0x20] sm:$0xff]   ;;  %v2663_v7 = vld [vmem:[%s3190_s17 + $0x28] sm:$0xff]   ;;  %2597 = vmatpush3.msra.mxu1 %v920_v19 }
  0x1d   : > { %v2664_v8 = vld [vmem:[%s3190_s17 + $0x30] sm:$0xff]   ;;  %v2665_v9 = vld [vmem:[%s3190_s17 + $0x38] sm:$0xff]   ;;  %v2666_v10 = vld [vmem:[%s3190_s17 + $0x40] sm:$0xff]   ;;  %2582 = vmatprep.subr.mxu1 %v919_v20 }
  0x1e   : > { %2467 = vmatpush3.bf16.msra.mxu0 %v2657_v1  ;;  %v2667_v11 = vld [vmem:[%s3190_s17 + $0x48] sm:$0xff]   ;;  %v2668_v12 = vld [vmem:[%s3190_s17 + $0x50] sm:$0xff]   ;;  %v2669_v13 = vld [vmem:[%s3190_s17 + $0x58] sm:$0xff]   ;;  %2598 = vmatpush3.msra.mxu1 %v919_v20 }
  0x1f   : > { %v2670_v14 = vld [vmem:[%s3190_s17 + $0x60] sm:$0xff]   ;;  %v2671_v15 = vld [vmem:[%s3190_s17 + $0x68] sm:$0xff]   ;;  %v2672_v16 = vld [vmem:[%s3190_s17 + $0x70] sm:$0xff]   ;;  %2500 = vmatprep.subr.mxu0 %v921_v18  ;;  %2583 = vmatprep.subr.mxu1 %v918_v21 }
  0x20   : > { %v2673_v17 = vld [vmem:[%s3190_s17 + $0x78] sm:$0xff]   ;;  %2599 = vmatpush3.msra.mxu1 %v918_v21  ;;  %v914_v25 = vld [vmem:[%s4108_s7 + $0x40] sm:$0xff]  ;;  %v912_v27 = vld [vmem:[%s4108_s7 + $0x30] sm:$0xff]  ;;  %s3680_s17 = scalar_lea.vmem %s4110_s9, %s2325_s13  ;;  %s388_s19 = smax.f32 %s3059_s18, %s387_s14 }
  0x21   : > { %2469 = vmatmul.mubr.msk.bf16.vlgmr.msra.gmra.mxu0 %vm536_vm0, %v2659_v3  ;;  %2584 = vmatprep.subr.mxu1 %v917_v22  ;;  %v913_v26 = vld [vmem:[%s4108_s7 + $0x38] sm:$0xff]  ;;  %v911_v28 = vld [vmem:[%s4108_s7 + $0x28] sm:$0xff]  ;;  %v3260_v29 = vld [vmem:[%s4107_s6] ss:$0 sm:$0xff]  ;;  %s390_s2 = smax.f32 %s3059_s18, %s389_s11  ;;  %s371_s14 = sand.u32 1, %s3048_s22  }
  0x22   : > { %2472 = vmatprep.mubr.msk.bf16.mxu0 %vm536_vm0, %v2660_v4  ;;  %2501 = vmatpush3.msra.mxu0 %v921_v18  ;;  %v910_v49 = vld [vmem:[%s4108_s7 + $0x20] sm:$0xff]  ;;  %v909_v54 = vld [vmem:[%s4108_s7 + $0x18] sm:$0xff]  ;;  %v908_v59 = vld [vmem:[%s4108_s7 + $0x10] sm:$0xff]  ;;  %s3695_s30 = smin.f32 %s3060_s29, %s390_s2  ;;  %s2321_s15 = sshll.u32 %s371_s14, 3 }
  0x23   : > { %2502 = vmatprep.subr.mxu0 %v920_v19  ;;  %2600 = vmatpush3.msra.mxu1 %v917_v22  ;;  %v907_v1 = vld [vmem:[%s4108_s7 + $0x8] sm:$0xff]  ;;  %s1828_s13 = ssub.f32 1.0, %s3695_s30  ;;  %s2244_s2 = scalar_lea.hbm %s4111_s10, %s2395_s16 }
  0x24   : > { %2503 = vmatpush3.msra.mxu0 %v920_v19  ;;  %2585 = vmatprep.subr.mxu1 %v916_v23  ;;  %s3061_s29 = smov [#allocation6]  }
  0x25   : > { %2504 = vmatprep.subr.mxu0 %v919_v20  ;;  %2601 = vmatpush3.msra.mxu1 %v916_v23 }
  0x26   : > { %2505 = vmatpush3.msra.mxu0 %v919_v20  ;;  %2586 = vmatprep.subr.mxu1 %v915_v24 }
  0x27   : > { %2506 = vmatprep.subr.mxu0 %v918_v21  ;;  %2602 = vmatpush3.msra.mxu1 %v915_v24 }
  0x28   : > { %2507 = vmatpush3.msra.mxu0 %v918_v21  ;;  %2587 = vmatprep.subr.mxu1 %v914_v25 }
  0x29   : > { %2473 = vmatmul.mubr.msk.bf16.gmra.mxu0 %vm536_vm0, %v2661_v5  ;;  %2508 = vmatprep.subr.mxu0 %v917_v22  ;;  %v906_v5 = vld [vmem:[%s4108_s7] sm:$0xff] }
  0x2a   : > { %2476 = vmatprep.mubr.msk.bf16.mxu0 %vm536_vm0, %v2662_v6  ;;  %2509 = vmatpush3.msra.mxu0 %v917_v22 }
  0x2b   : > { %2510 = vmatprep.subr.mxu0 %v916_v23  ;;  %2603 = vmatpush3.msra.mxu1 %v914_v25 }
  0x2c   : > { %2511 = vmatpush3.msra.mxu0 %v916_v23  ;;  %2588 = vmatprep.subr.mxu1 %v913_v26 }
  0x2d   : > { %2512 = vmatprep.subr.mxu0 %v915_v24  ;;  %2604 = vmatpush3.msra.mxu1 %v913_v26 }
  0x2e   : > { %2513 = vmatpush3.msra.mxu0 %v915_v24  ;;  %2589 = vmatprep.subr.mxu1 %v912_v27 }
  0x2f   : > { %2514 = vmatprep.subr.mxu0 %v914_v25  ;;  %2605 = vmatpush3.msra.mxu1 %v912_v27 }
  0x30   : > { %2515 = vmatpush3.msra.mxu0 %v914_v25  ;;  %2590 = vmatprep.subr.mxu1 %v911_v28 }
  0x31   : > { %2477 = vmatmul.mubr.msk.bf16.gmra.mxu0 %vm536_vm0, %v2663_v7  ;;  %2516 = vmatprep.subr.mxu0 %v913_v26 }
  0x32   : > { %2480 = vmatprep.mubr.msk.bf16.mxu0 %vm536_vm0, %v2664_v8  ;;  %2517 = vmatpush3.msra.mxu0 %v913_v26 }
  0x33   : > { %2518 = vmatprep.subr.mxu0 %v912_v27  ;;  %2606 = vmatpush3.msra.mxu1 %v911_v28 }
  0x34   : > { %2519 = vmatpush3.msra.mxu0 %v912_v27  ;;  %2591 = vmatprep.subr.mxu1 %v910_v49 }
  0x35   : > { %2520 = vmatprep.subr.mxu0 %v911_v28  ;;  %2607 = vmatpush3.msra.mxu1 %v910_v49 }
  0x36   : > { %2521 = vmatpush3.msra.mxu0 %v911_v28  ;;  %2592 = vmatprep.subr.mxu1 %v909_v54 }
  0x37   : > { %2522 = vmatprep.subr.mxu0 %v910_v49  ;;  %2608 = vmatpush3.msra.mxu1 %v909_v54 }
  0x38   : > { %2523 = vmatpush3.msra.mxu0 %v910_v49  ;;  %2593 = vmatprep.subr.mxu1 %v908_v59 }
  0x39   : > { %2481 = vmatmul.mubr.msk.bf16.gmra.mxu0 %vm536_vm0, %v2665_v9  ;;  %2524 = vmatprep.subr.mxu0 %v909_v54 }
  0x3a   : > { %2484 = vmatprep.mubr.msk.bf16.mxu0 %vm536_vm0, %v2666_v10  ;;  %2525 = vmatpush3.msra.mxu0 %v909_v54 }
  0x3b   : > { %2526 = vmatprep.subr.mxu0 %v908_v59  ;;  %2609 = vmatpush3.msra.mxu1 %v908_v59 }
  0x3c   : > { %2527 = vmatpush3.msra.mxu0 %v908_v59  ;;  %2594 = vmatprep.subr.mxu1 %v907_v1 }
  0x3d   : > { %2528 = vmatprep.subr.mxu0 %v907_v1  ;;  %2610 = vmatpush3.msra.mxu1 %v907_v1 }
  0x3e   : > { %2529 = vmatpush3.msra.mxu0 %v907_v1  ;;  %2595 = vmatprep.subr.mxu1 %v906_v5 }
  0x3f   : > { %2530 = vmatprep.subr.mxu0 %v906_v5  ;;  %2611 = vmatpush3.msra.mxu1 %v906_v5 }
  0x40   : > { %2531 = vmatpush3.msra.mxu0 %v906_v5 }
  0x41   : > { %2485 = vmatmul.mubr.msk.bf16.gmra.mxu0 %vm536_vm0, %v2667_v11 }
  0x42   : > { %2488 = vmatprep.mubr.msk.bf16.mxu0 %vm536_vm0, %v2668_v12 }
  0x49   : > { %2489 = vmatmul.mubr.msk.bf16.gmra.mxu0 %vm536_vm0, %v2669_v13 }
  0x4a   : > { %2492 = vmatprep.mubr.msk.bf16.mxu0 %vm536_vm0, %v2670_v14 }
  0x51   : > { %2493 = vmatmul.mubr.msk.bf16.gmra.mxu0 %vm536_vm0, %v2671_v15 }
  0x52   : > { %2496 = vmatprep.mubr.msk.bf16.mxu0 %vm536_vm0, %v2672_v16 }
  0x59   : > { %2497 = vmatmul.mubr.msk.bf16.gmra.mxu0 %vm536_vm0, %v2673_v17 }
  0xe1   : > { %v2470_v30 = vpop.f32.mrf.mxu0 }
  0xe2   : > { %v3263_v31 = vadd.f32 %v2470_v30, %v3260_v29 }
  0xe3   : > { %v619_v32 = vpop.f32.mrf.mxu0 }
  0xe4   : > { %v3266_v33 = vadd.f32 %v3260_v29, %v619_v32  ;;  %750 = vmax.xlane.f32.xlu1 %v3263_v31 }
  0xe5   : > { %v2471_v34 = vpop.f32.mrf.mxu0 }
  0xe6   : > { %v3270_v35 = vadd.f32 %v2471_v34, %v3260_v29  ;;  %746 = vmax.xlane.f32.xlu0 %v3266_v33 }
  0xe7   : > { %v622_v36 = vpop.f32.mrf.mxu0 }
  0xe8   : > { %v3274_v37 = vadd.f32 %v3260_v29, %v622_v36  ;;  %752 = vmax.xlane.f32.xlu1 %v3270_v35 }
  0xe9   : > { %v2474_v38 = vpop.f32.mrf.mxu0 }
  0xea   : > { %748 = vmax.xlane.f32.xlu0 %v3274_v37  ;;  %v3283_v43 = vadd.f32 %v2474_v38, %v3260_v29 }
  0xeb   : > { %v635_v39 = vpop.f32.mrf.mxu0 }
  0xec   : > { %v3279_v40 = vadd.f32 %v3260_v29, %v635_v39 }
  0xed   : > { %v2475_v41 = vpop.f32.mrf.mxu0 }
  0xee   : > { %754 = vmax.xlane.f32.xlu0 %v3279_v40  ;;  %v3291_v47 = vadd.f32 %v2475_v41, %v3260_v29  ;;  %v3408_v41 = vld [vmem:[%s4109_s8] sm:$0x1] }
  0xef   : > { %v638_v42 = vpop.f32.mrf.mxu0 }
  0xf0   : > { %v3286_v44 = vadd.f32 %v3260_v29, %v638_v42  ;;  %v394_v42 = vmax.f32 %v3408_v41, 0.0 }
  0xf1   : > { %v2478_v45 = vpop.f32.mrf.mxu0 }
  0xf2   : > { %756 = vmax.xlane.f32.xlu1 %v3286_v44  ;;  %758 = vmax.xlane.f32.xlu0 %v3283_v43  ;;  %v3300_v51 = vadd.f32 %v2478_v45, %v3260_v29  ;;  %v396_v45 = vsel %vm395_vm1, %v394_v42, 0.0 }
  0xf3   : > { %v651_v46 = vpop.f32.mrf.mxu0 }
  0xf4   : > { %v3294_v48 = vadd.f32 %v3260_v29, %v651_v46 }
  0xf5   : > { %v2479_v50 = vpop.f32.mrf.mxu0 }
  0xf6   : > { %760 = vmax.xlane.f32.xlu1 %v3291_v47  ;;  %762 = vmax.xlane.f32.xlu0 %v3294_v48  ;;  %v3313_v57 = vadd.f32 %v2479_v50, %v3260_v29 }
  0xf7   : > { %v654_v52 = vpop.f32.mrf.mxu0 }
  0xf8   : > { %v3305_v53 = vadd.f32 %v3260_v29, %v654_v52 }
  0xf9   : > { %v2482_v55 = vpop.f32.mrf.mxu0 }
  0xfa   : > { %764 = vmax.xlane.f32.xlu1 %v3305_v53  ;;  %766 = vmax.xlane.f32.xlu0 %v3300_v51  ;;  %v3322_v61 = vadd.f32 %v2482_v55, %v3260_v29 }
  0xfb   : > { %v667_v56 = vpop.f32.mrf.mxu0 }
  0xfc   : > { %v3316_v58 = vadd.f32 %v3260_v29, %v667_v56 }
  0xfd   : > { %v2483_v60 = vpop.f32.mrf.mxu0 }
  0xfe   : > { %768 = vmax.xlane.f32.xlu1 %v3313_v57  ;;  %770 = vmax.xlane.f32.xlu0 %v3316_v58  ;;  %v3335_v3 = vadd.f32 %v2483_v60, %v3260_v29 }
  0xff   : > { %v670_v62 = vpop.f32.mrf.mxu0 }
 0x100   : > { %v3327_v63 = vadd.f32 %v3260_v29, %v670_v62 }
 0x101   : > { %v2486_v0 = vpop.f32.mrf.mxu0 }
 0x102   : > { %772 = vmax.xlane.f32.xlu1 %v3327_v63  ;;  %774 = vmax.xlane.f32.xlu0 %v3322_v61  ;;  %v3344_v7 = vadd.f32 %v2486_v0, %v3260_v29 }
 0x103   : > { %v683_v2 = vpop.f32.mrf.mxu0 }
 0x104   : > { %v3338_v4 = vadd.f32 %v3260_v29, %v683_v2 }
 0x105   : > { %v2487_v6 = vpop.f32.mrf.mxu0 }
 0x106   : > { %776 = vmax.xlane.f32.xlu1 %v3335_v3  ;;  %778 = vmax.xlane.f32.xlu0 %v3338_v4  ;;  %v3354_v12 = vadd.f32 %v2487_v6, %v3260_v29 }
 0x107   : > { %v686_v8 = vpop.f32.mrf.mxu0 }
 0x108   : > { %v3349_v9 = vadd.f32 %v3260_v29, %v686_v8 }
 0x109   : > { %v2490_v10 = vpop.f32.mrf.mxu0 }
 0x10a   : > { %780 = vmax.xlane.f32.xlu1 %v3349_v9  ;;  %782 = vmax.xlane.f32.xlu0 %v3344_v7  ;;  %v3360_v15 = vadd.f32 %v2490_v10, %v3260_v29 }
 0x10b   : > { %v699_v11 = vpop.f32.mrf.mxu0 }
 0x10c   : > { %v3357_v13 = vadd.f32 %v3260_v29, %v699_v11 }
 0x10d   : > { %v2491_v14 = vpop.f32.mrf.mxu0 }
 0x10e   : > { %784 = vmax.xlane.f32.xlu1 %v3354_v12  ;;  %786 = vmax.xlane.f32.xlu0 %v3357_v13  ;;  %v3370_v20 = vadd.f32 %v2491_v14, %v3260_v29 }
 0x10f   : > { %v702_v16 = vpop.f32.mrf.mxu0 }
 0x110   : > { %v3365_v17 = vadd.f32 %v3260_v29, %v702_v16 }
 0x111   : > { %v2494_v18 = vpop.f32.mrf.mxu0 }
 0x112   : > { %788 = vmax.xlane.f32.xlu1 %v3365_v17  ;;  %790 = vmax.xlane.f32.xlu0 %v3360_v15  ;;  %v3376_v23 = vadd.f32 %v2494_v18, %v3260_v29 }
 0x113   : > { %v715_v19 = vpop.f32.mrf.mxu0 }
 0x114   : > { %v3373_v21 = vadd.f32 %v3260_v29, %v715_v19 }
 0x115   : > { %v2495_v22 = vpop.f32.mrf.mxu0 }
 0x116   : > { %792 = vmax.xlane.f32.xlu1 %v3370_v20  ;;  %794 = vmax.xlane.f32.xlu0 %v3373_v21  ;;  %v3386_v28 = vadd.f32 %v2495_v22, %v3260_v29 }
 0x117   : > { %v718_v24 = vpop.f32.mrf.mxu0 }
 0x118   : > { %v3381_v25 = vadd.f32 %v3260_v29, %v718_v24 }
 0x119   : > { %v2498_v26 = vpop.f32.mrf.mxu0 }
 0x11a   : > { %796 = vmax.xlane.f32.xlu1 %v3381_v25  ;;  %798 = vmax.xlane.f32.xlu0 %v3376_v23  ;;  %v3392_v34 = vadd.f32 %v2498_v26, %v3260_v29 }
 0x11b   : > { %v731_v27 = vpop.f32.mrf.mxu0 }
 0x11c   : > { %v3389_v30 = vadd.f32 %v3260_v29, %v731_v27 }
 0x11d   : > { %v2499_v32 = vpop.f32.mrf.mxu0 }
 0x11e   : > { %800 = vmax.xlane.f32.xlu1 %v3386_v28  ;;  %802 = vmax.xlane.f32.xlu0 %v3389_v30  ;;  %v3402_v39 = vadd.f32 %v2499_v32, %v3260_v29 }
 0x11f   : > { %v734_v36 = vpop.f32.mrf.mxu0 }
 0x120   : > { %v3397_v38 = vadd.f32 %v3260_v29, %v734_v36 }
 0x122   : > { %804 = vmax.xlane.f32.xlu1 %v3397_v38  ;;  %806 = vmax.xlane.f32.xlu0 %v3392_v34 }
 0x126   : > { %808 = vmax.xlane.f32.xlu1 %v3402_v39  ;;  %397 = vadd.xlane.f32.xlu0 %v396_v45 }
 0x16d   : > { %v751_v46 = vpop.xlane.xlu1 %750 }
 0x16e   : > { %v812_v29 = vsub.f32 %v3263_v31, %v751_v46 }
 0x16f   : > { %v747_v49 = vpop.xlane.xlu0 %746 }
 0x170   : > { %v810_v50 = vsub.f32 %v3266_v33, %v747_v49  ;;  %v846_v60 = vmul.f32 1.442695, %v812_v29 }
 0x171   : > { %v753_v52 = vpop.xlane.xlu1 %752 }
 0x172   : > { %v842_v54 = vmul.f32 1.442695, %v810_v50  ;;  %v813_v55 = vsub.f32 %v3270_v35, %v753_v52 }
 0x173   : > { %v749_v56 = vpop.xlane.xlu0 %748 }
 0x174   : > { %2674 = vpow2.f32 %v842_v54  ;;  %v811_v59 = vsub.f32 %v3274_v37, %v749_v56  ;;  %v848_v0 = vmul.f32 1.442695, %v813_v55 }
 0x176   : > { %v844_v62 = vmul.f32 1.442695, %v811_v59 }
 0x177   : > { %v755_v1 = vpop.xlane.xlu0 %754 }
 0x178   : > { %2676 = vpow2.f32 %v844_v62  ;;  %v814_v2 = vsub.f32 %v3279_v40, %v755_v1 }
 0x179   : > { %2678 = vpow2.f32 %v846_v60 }
 0x17a   : > { %v850_v5 = vmul.f32 1.442695, %v814_v2  ;;  %2680 = vpow2.f32 %v848_v0 }
 0x17b   : > { %v757_v33 = vpop.xlane.xlu1 %756  ;;  %v759_v31 = vpop.xlane.xlu0 %758 }
 0x17c   : > { %2682 = vpow2.f32 %v850_v5  ;;  %v815_v6 = vsub.f32 %v3286_v44, %v757_v33  ;;  %v816_v35 = vsub.f32 %v3283_v43, %v759_v31 }
 0x17e   : > { %v852_v8 = vmul.f32 1.442695, %v815_v6  ;;  %v854_v10 = vmul.f32 1.442695, %v816_v35 }
 0x17f   : > { %v761_v37 = vpop.xlane.xlu1 %760  ;;  %v763_v11 = vpop.xlane.xlu0 %762 }
 0x180   : > { %2684 = vpow2.f32 %v852_v8  ;;  %v817_v14 = vsub.f32 %v3291_v47, %v761_v37  ;;  %v818_v16 = vsub.f32 %v3294_v48, %v763_v11 }
 0x181   : > { %v2675_v40 = vpop.eup %2674  ;;  %2686 = vpow2.f32 %v854_v10 }
 0x182   : > { %v856_v18 = vmul.f32 1.442695, %v817_v14  ;;  %v858_v19 = vmul.f32 1.442695, %v818_v16  ;;  %2532 = vmatprep.mubr.f32.mxu0 %v2675_v40 }
 0x183   : > { %v765_v22 = vpop.xlane.xlu1 %764  ;;  %v767_v24 = vpop.xlane.xlu0 %766 }
 0x184   : > { %2688 = vpow2.f32 %v856_v18  ;;  %v819_v44 = vsub.f32 %v3305_v53, %v765_v22  ;;  %v820_v43 = vsub.f32 %v3300_v51, %v767_v24 }
 0x185   : > { %v2677_v26 = vpop.eup %2676  ;;  %2690 = vpow2.f32 %v858_v19 }
 0x186   : > { %v2679_v27 = vpop.eup %2678  ;;  %v860_v32 = vmul.f32 1.442695, %v819_v44  ;;  %v862_v36 = vmul.f32 1.442695, %v820_v43  ;;  %2533 = vmatmul.mubr.f32.vlgmr.msra.gmra.mxu0 %v2677_v26 }
 0x187   : > { %v769_v47 = vpop.xlane.xlu1 %768  ;;  %2535 = vmatprep.mubr.f32.mxu0 %v2679_v27  ;;  %v771_v48 = vpop.xlane.xlu0 %770 }
 0x188   : > { %v2681_v45 = vpop.eup %2680  ;;  %2692 = vpow2.f32 %v860_v32  ;;  %v821_v46 = vsub.f32 %v3313_v57, %v769_v47  ;;  %v822_v49 = vsub.f32 %v3316_v58, %v771_v48 }
 0x189   : > { %v2683_v50 = vpop.eup %2682  ;;  %2694 = vpow2.f32 %v862_v36 }
 0x18a   : > { %v864_v53 = vmul.f32 1.442695, %v821_v46  ;;  %v866_v29 = vmul.f32 1.442695, %v822_v49  ;;  %2536 = vmatmul.mubr.f32.gmra.mxu0 %v2681_v45 }
 0x18b   : > { %v773_v51 = vpop.xlane.xlu1 %772  ;;  %2538 = vmatprep.mubr.f32.mxu0 %v2683_v50  ;;  %v775_v52 = vpop.xlane.xlu0 %774 }
 0x18c   : > { %2696 = vpow2.f32 %v864_v53  ;;  %v823_v54 = vsub.f32 %v3327_v63, %v773_v51  ;;  %v824_v55 = vsub.f32 %v3322_v61, %v775_v52 }
 0x18d   : > { %v2685_v56 = vpop.eup %2684  ;;  %2698 = vpow2.f32 %v866_v29 }
 0x18e   : > { %v2687_v59 = vpop.eup %2686  ;;  %v868_v60 = vmul.f32 1.442695, %v823_v54  ;;  %v870_v57 = vmul.f32 1.442695, %v824_v55  ;;  %2539 = vmatmul.mubr.f32.gmra.mxu0 %v2685_v56 }
 0x18f   : > { %2541 = vmatprep.mubr.f32.mxu1 %v2687_v59  ;;  %v777_v58 = vpop.xlane.xlu1 %776  ;;  %v779_v62 = vpop.xlane.xlu0 %778 }
 0x190   : > { %2700 = vpow2.f32 %v868_v60  ;;  %v825_v0 = vsub.f32 %v3335_v3, %v777_v58  ;;  %v826_v1 = vsub.f32 %v3338_v4, %v779_v62 }
 0x191   : > { %v2689_v2 = vpop.eup %2688  ;;  %2702 = vpow2.f32 %v870_v57 }
 0x192   : > { %v2691_v5 = vpop.eup %2690  ;;  %v872_v63 = vmul.f32 1.442695, %v825_v0  ;;  %v874_v33 = vmul.f32 1.442695, %v826_v1  ;;  %2542 = vmatmul.mubr.f32.vlgmr.msra.gmra.mxu1 %v2689_v2 }
 0x193   : > { %v781_v61 = vpop.xlane.xlu1 %780  ;;  %2544 = vmatprep.mubr.f32.mxu1 %v2691_v5  ;;  %v783_v31 = vpop.xlane.xlu0 %782 }
 0x194   : > { %2704 = vpow2.f32 %v872_v63  ;;  %v827_v6 = vsub.f32 %v3349_v9, %v781_v61  ;;  %v828_v35 = vsub.f32 %v3344_v7, %v783_v31 }
 0x195   : > { %v2693_v8 = vpop.eup %2692  ;;  %2706 = vpow2.f32 %v874_v33 }
 0x196   : > { %v2695_v10 = vpop.eup %2694  ;;  %v876_v3 = vmul.f32 1.442695, %v827_v6  ;;  %v878_v37 = vmul.f32 1.442695, %v828_v35  ;;  %2545 = vmatmul.mubr.f32.gmra.mxu1 %v2693_v8 }
 0x197   : > { %v785_v4 = vpop.xlane.xlu1 %784  ;;  %2547 = vmatprep.mubr.f32.mxu1 %v2695_v10  ;;  %v787_v11 = vpop.xlane.xlu0 %786 }
 0x198   : > { %2708 = vpow2.f32 %v876_v3  ;;  %v829_v14 = vsub.f32 %v3354_v12, %v785_v4  ;;  %v830_v16 = vsub.f32 %v3357_v13, %v787_v11 }
 0x199   : > { %v2697_v40 = vpop.eup %2696  ;;  %2710 = vpow2.f32 %v878_v37 }
 0x19a   : > { %v2699_v18 = vpop.eup %2698  ;;  %v880_v9 = vmul.f32 1.442695, %v829_v14  ;;  %v882_v19 = vmul.f32 1.442695, %v830_v16  ;;  %2548 = vmatmul.mubr.f32.gmra.mxu1 %v2697_v40 }
 0x19b   : > { %v789_v7 = vpop.xlane.xlu1 %788  ;;  %2550 = vmatprep.mubr.f32.mxu1 %v2699_v18  ;;  %v791_v22 = vpop.xlane.xlu0 %790 }
 0x19c   : > { %2712 = vpow2.f32 %v880_v9  ;;  %v831_v24 = vsub.f32 %v3365_v17, %v789_v7  ;;  %v832_v44 = vsub.f32 %v3360_v15, %v791_v22 }
 0x19d   : > { %v2701_v43 = vpop.eup %2700  ;;  %2714 = vpow2.f32 %v882_v19 }
 0x19e   : > { %v2703_v26 = vpop.eup %2702  ;;  %v884_v12 = vmul.f32 1.442695, %v831_v24  ;;  %v886_v27 = vmul.f32 1.442695, %v832_v44  ;;  %2551 = vmatmul.mubr.f32.gmra.mxu1 %v2701_v43 }
 0x19f   : > { %v793_v13 = vpop.xlane.xlu1 %792  ;;  %2553 = vmatprep.mubr.f32.mxu1 %v2703_v26  ;;  %v795_v32 = vpop.xlane.xlu0 %794 }
 0x1a0   : > { %2716 = vpow2.f32 %v884_v12  ;;  %v833_v36 = vsub.f32 %v3370_v20, %v793_v13  ;;  %v834_v47 = vsub.f32 %v3373_v21, %v795_v32 }
 0x1a1   : > { %v2705_v48 = vpop.eup %2704  ;;  %2718 = vpow2.f32 %v886_v27 }
 0x1a2   : > { %v2707_v45 = vpop.eup %2706  ;;  %v888_v17 = vmul.f32 1.442695, %v833_v36  ;;  %v890_v46 = vmul.f32 1.442695, %v834_v47  ;;  %2554 = vmatmul.mubr.f32.gmra.mxu1 %v2705_v48 }
 0x1a3   : > { %v797_v15 = vpop.xlane.xlu1 %796  ;;  %2556 = vmatprep.mubr.f32.mxu1 %v2707_v45  ;;  %v799_v49 = vpop.xlane.xlu0 %798 }
 0x1a4   : > { %2720 = vpow2.f32 %v888_v17  ;;  %v835_v50 = vsub.f32 %v3381_v25, %v797_v15  ;;  %v836_v53 = vsub.f32 %v3376_v23, %v799_v49 }
 0x1a5   : > { %v2709_v29 = vpop.eup %2708  ;;  %2722 = vpow2.f32 %v890_v46 }
 0x1a6   : > { %v2711_v51 = vpop.eup %2710  ;;  %v892_v20 = vmul.f32 1.442695, %v835_v50  ;;  %v894_v52 = vmul.f32 1.442695, %v836_v53  ;;  %2557 = vmatmul.mubr.f32.gmra.mxu1 %v2709_v29 }
 0x1a7   : > { %v801_v21 = vpop.xlane.xlu1 %800  ;;  %2559 = vmatprep.mubr.f32.mxu1 %v2711_v51  ;;  %v803_v54 = vpop.xlane.xlu0 %802 }
 0x1a8   : > { %2724 = vpow2.f32 %v892_v20  ;;  %v837_v55 = vsub.f32 %v3386_v28, %v801_v21  ;;  %v838_v56 = vsub.f32 %v3389_v30, %v803_v54 }
 0x1a9   : > { %v2713_v59 = vpop.eup %2712  ;;  %2726 = vpow2.f32 %v894_v52 }
 0x1aa   : > { %v2715_v60 = vpop.eup %2714  ;;  %v896_v25 = vmul.f32 1.442695, %v837_v55  ;;  %v898_v57 = vmul.f32 1.442695, %v838_v56  ;;  %2560 = vmatmul.mubr.f32.gmra.mxu1 %v2713_v59 }
 0x1ab   : > { %v805_v23 = vpop.xlane.xlu1 %804  ;;  %2562 = vmatprep.mubr.f32.mxu1 %v2715_v60  ;;  %v807_v58 = vpop.xlane.xlu0 %806 }
 0x1ac   : > { %2728 = vpow2.f32 %v896_v25  ;;  %v839_v62 = vsub.f32 %v3397_v38, %v805_v23  ;;  %v840_v0 = vsub.f32 %v3392_v34, %v807_v58 }
 0x1ad   : > { %v2717_v1 = vpop.eup %2716  ;;  %2730 = vpow2.f32 %v898_v57 }
 0x1ae   : > { %v2719_v2 = vpop.eup %2718  ;;  %v900_v28 = vmul.f32 1.442695, %v839_v62  ;;  %v902_v5 = vmul.f32 1.442695, %v840_v0  ;;  %2563 = vmatmul.mubr.f32.gmra.mxu1 %v2717_v1 }
 0x1af   : > { %v809_v30 = vpop.xlane.xlu1 %808  ;;  %2565 = vmatprep.mubr.f32.mxu1 %v2719_v2 }
 0x1b0   : > { %2732 = vpow2.f32 %v900_v28  ;;  %v841_v63 = vsub.f32 %v3402_v39, %v809_v30 }
 0x1b1   : > { %v2721_v33 = vpop.eup %2720  ;;  %2734 = vpow2.f32 %v902_v5 }
 0x1b2   : > { %v2723_v61 = vpop.eup %2722  ;;  %v904_v31 = vmul.f32 1.442695, %v841_v63  ;;  %2566 = vmatmul.mubr.f32.gmra.mxu1 %v2721_v33 }
 0x1b3   : > { %2568 = vmatprep.mubr.f32.mxu1 %v2723_v61 }
 0x1b4   : > { %2736 = vpow2.f32 %v904_v31 }
 0x1b5   : > { %v2725_v38 = vpop.eup %2724 }
 0x1b6   : > { %v2727_v34 = vpop.eup %2726  ;;  %2569 = vmatmul.mubr.f32.gmra.mxu1 %v2725_v38 }
 0x1b7   : > { %2571 = vmatprep.mubr.f32.mxu1 %v2727_v34 }
 0x1b9   : > { %v2729_v6 = vpop.eup %2728 }
 0x1ba   : > { %v2731_v35 = vpop.eup %2730  ;;  %2572 = vmatmul.mubr.f32.gmra.mxu1 %v2729_v6 }
 0x1bb   : > { %2574 = vmatprep.mubr.f32.mxu1 %v2731_v35 }
 0x1bd   : > { %v2733_v8 = vpop.eup %2732 }
 0x1be   : > { %v2735_v10 = vpop.eup %2734  ;;  %2575 = vmatmul.mubr.f32.gmra.mxu1 %v2733_v8 }
 0x1bf   : > { %2577 = vmatprep.mubr.f32.mxu1 %v2735_v10 }
 0x1c1   : > { %v2737_v39 = vpop.eup %2736 }
 0x1c2   : > { %2578 = vmatmul.mubr.f32.gmra.mxu1 %v2737_v39 }
 0x246   : > { %v3445_v3 = vpop.f32.mrf.mxu0 }
 0x247   : > { %2738 = vrcp.f32 %v3445_v3 }
 0x248   : > { %v3448_v37 = vpop.f32.mrf.mxu0 }
 0x249   : > { %2740 = vrcp.f32 %v3448_v37 }
 0x24a   : > { %v3451_v4 = vpop.f32.mrf.mxu0 }
 0x24b   : > { %2742 = vrcp.f32 %v3451_v4 }
 0x24c   : > { %v3454_v11 = vpop.f32.mrf.mxu0 }
 0x24d   : > { %2744 = vrcp.f32 %v3454_v11 }
 0x24e   : > { %v3457_v14 = vpop.f32.mrf.mxu0 }
 0x250   : > { %v3466_v19 = vpop.f32.mrf.mxu0 }
 0x252   : > { %v3459_v16 = vpop.f32.mrf.mxu1 }
 0x253   : > { %2746 = vrcp.f32 %v3459_v16 }
 0x254   : > { %v2739_v40 = vpop.eup %2738  ;;  %v3462_v18 = vpop.f32.mrf.mxu1 }
 0x255   : > { %2748 = vrcp.f32 %v3462_v18  ;;  %1213 = vrot.lane.b32.xlu0 %v2739_v40, %s3058_s12 }
 0x256   : > { %v2741_v9 = vpop.eup %2740  ;;  %v3468_v7 = vpop.f32.mrf.mxu1  ;;  %2750 = vrcp.f32 %v3457_v14 }
 0x257   : > { %1211 = vrot.lane.b32.xlu1 %v2741_v9, %s3058_s12  ;;  %2752 = vrcp.f32 %v3466_v19 }
 0x258   : > { %v3472_v22 = vpop.f32.mrf.mxu1  ;;  %v2743_v24 = vpop.eup %2742  ;;  %2754 = vrcp.f32 %v3468_v7 }
 0x259   : > { %2756 = vrcp.f32 %v3472_v22 }
 0x25a   : > { %v3475_v44 = vpop.f32.mrf.mxu1  ;;  %v2745_v26 = vpop.eup %2744 }
 0x25b   : > { %1217 = vrot.lane.b32.xlu1 %v2743_v24, %s3058_s12  ;;  %2758 = vrcp.f32 %v3475_v44  ;;  %v398_v24 = vpop.xlane.xlu0 %397 }
 0x25c   : > { %v3479_v43 = vpop.f32.mrf.mxu1 }
 0x25d   : > { %2760 = vrcp.f32 %v3479_v43 }
 0x25e   : > { %v3482_v12 = vpop.f32.mrf.mxu1 }
 0x25f   : > { %1215 = vrot.lane.b32.xlu1 %v2745_v26, %s3058_s12  ;;  %2762 = vrcp.f32 %v3482_v12  ;;  %v1340_v26 = vlaneseq }
 0x260   : > { %v2747_v27 = vpop.eup %2746  ;;  %v3486_v13 = vpop.f32.mrf.mxu1 }
 0x261   : > { %1225 = vrot.lane.b32.xlu0 %v2747_v27, %s3058_s12  ;;  %2764 = vrcp.f32 %v3486_v13  ;;  %v3573_v27 = vshrl.u32 %v1340_v26, 7 }
 0x262   : > { %v2749_v32 = vpop.eup %2748  ;;  %v3490_v36 = vpop.f32.mrf.mxu1 }
 0x263   : > { %1223 = vrot.lane.b32.xlu1 %v2749_v32, %s3058_s12  ;;  %v2751_v47 = vpop.eup %2750  ;;  %2766 = vrcp.f32 %v3490_v36 }
 0x264   : > { %v3494_v48 = vpop.f32.mrf.mxu1  ;;  %v2753_v45 = vpop.eup %2752 }
 0x265   : > { %1221 = vrot.lane.b32.xlu0 %v2751_v47, %s3058_s12  ;;  %v2755_v46 = vpop.eup %2754  ;;  %2768 = vrcp.f32 %v3494_v48  ;;  %v1342_v47 = vsub.s32 0, %v3573_v27 }
 0x266   : > { %v3498_v17 = vpop.f32.mrf.mxu1  ;;  %v2757_v49 = vpop.eup %2756 }
 0x267   : > { %1219 = vrot.lane.b32.xlu1 %v2753_v45, %s3058_s12  ;;  %2770 = vrcp.f32 %v3498_v17 }
 0x268   : > { %v3502_v15 = vpop.f32.mrf.mxu1  ;;  %v2759_v53 = vpop.eup %2758 }
 0x269   : > { %1229 = vrot.lane.b32.xlu0 %v2755_v46, %s3058_s12  ;;  %2772 = vrcp.f32 %v3502_v15 }
 0x26a   : > { %v3506_v50 = vpop.f32.mrf.mxu1  ;;  %v2761_v51 = vpop.eup %2760 }
 0x26b   : > { %1227 = vrot.lane.b32.xlu1 %v2757_v49, %s3058_s12  ;;  %2774 = vrcp.f32 %v3506_v50 }
 0x26c   : > { %v3510_v29 = vpop.f32.mrf.mxu1  ;;  %v2763_v52 = vpop.eup %2762 }
 0x26d   : > { %1233 = vrot.lane.b32.xlu0 %v2759_v53, %s3058_s12  ;;  %2776 = vrcp.f32 %v3510_v29 }
 0x26e   : > { %v3514_v20 = vpop.f32.mrf.mxu1  ;;  %v2765_v54 = vpop.eup %2764 }
 0x26f   : > { %1231 = vrot.lane.b32.xlu1 %v2761_v51, %s3058_s12  ;;  %2778 = vrcp.f32 %v3514_v20 }
 0x270   : > { %v3518_v21 = vpop.f32.mrf.mxu1  ;;  %v2767_v56 = vpop.eup %2766 }
 0x271   : > { %1237 = vrot.lane.b32.xlu0 %v2763_v52, %s3058_s12  ;;  %2780 = vrcp.f32 %v3518_v21 }
 0x272   : > { %v3522_v55 = vpop.f32.mrf.mxu1  ;;  %v2769_v60 = vpop.eup %2768 }
 0x273   : > { %1235 = vrot.lane.b32.xlu1 %v2765_v54, %s3058_s12  ;;  %2782 = vrcp.f32 %v3522_v55 }
 0x274   : > { %v3526_v59 = vpop.f32.mrf.mxu1  ;;  %v2771_v57 = vpop.eup %2770 }
 0x275   : > { %1241 = vrot.lane.b32.xlu0 %v2767_v56, %s3058_s12  ;;  %2784 = vrcp.f32 %v3526_v59 }
 0x276   : > { %v3530_v25 = vpop.f32.mrf.mxu1  ;;  %v2773_v58 = vpop.eup %2772 }
 0x277   : > { %1239 = vrot.lane.b32.xlu1 %v2769_v60, %s3058_s12  ;;  %2786 = vrcp.f32 %v3530_v25 }
 0x278   : > { %v3534_v23 = vpop.f32.mrf.mxu1  ;;  %v2775_v0 = vpop.eup %2774 }
 0x279   : > { %1245 = vrot.lane.b32.xlu0 %v2771_v57, %s3058_s12  ;;  %2788 = vrcp.f32 %v3534_v23 }
 0x27a   : > { %v3538_v62 = vpop.f32.mrf.mxu1  ;;  %v2777_v2 = vpop.eup %2776 }
 0x27b   : > { %1243 = vrot.lane.b32.xlu1 %v2773_v58, %s3058_s12  ;;  %2790 = vrcp.f32 %v3538_v62 }
 0x27c   : > { %v3542_v1 = vpop.f32.mrf.mxu1  ;;  %v2779_v5 = vpop.eup %2778 }
 0x27d   : > { %1249 = vrot.lane.b32.xlu0 %v2775_v0, %s3058_s12  ;;  %2792 = vrcp.f32 %v3542_v1 }
 0x27e   : > { %v3546_v28 = vpop.f32.mrf.mxu1  ;;  %v2781_v63 = vpop.eup %2780 }
 0x27f   : > { %1247 = vrot.lane.b32.xlu1 %v2777_v2, %s3058_s12  ;;  %2794 = vrcp.f32 %v3546_v28 }
 0x280   : > { %v3550_v30 = vpop.f32.mrf.mxu1  ;;  %v2783_v61 = vpop.eup %2782 }
 0x281   : > { %1253 = vrot.lane.b32.xlu0 %v2779_v5, %s3058_s12  ;;  %2796 = vrcp.f32 %v3550_v30 }
 0x282   : > { %v3554_v33 = vpop.f32.mrf.mxu1  ;;  %v2785_v31 = vpop.eup %2784 }
 0x283   : > { %1251 = vrot.lane.b32.xlu1 %v2781_v63, %s3058_s12  ;;  %2798 = vrcp.f32 %v3554_v33 }
 0x284   : > { %v3560_v38 = vpop.f32.mrf.mxu1  ;;  %v2787_v34 = vpop.eup %2786 }
 0x285   : > { %1257 = vrot.lane.b32.xlu0 %v2783_v61, %s3058_s12  ;;  %2800 = vrcp.f32 %v3560_v38 }
 0x286   : > { %v2789_v6 = vpop.eup %2788  ;;  %2802 = vrcp.f32 %v398_v24 }
 0x287   : > { %1255 = vrot.lane.b32.xlu1 %v2785_v31, %s3058_s12 }
 0x288   : > { %v2791_v35 = vpop.eup %2790 }
 0x289   : > { %1261 = vrot.lane.b32.xlu0 %v2787_v34, %s3058_s12 }
 0x28a   : > { %v2793_v8 = vpop.eup %2792 }
 0x28b   : > { %1259 = vrot.lane.b32.xlu1 %v2789_v6, %s3058_s12 }
 0x28c   : > { %v2795_v10 = vpop.eup %2794 }
 0x28d   : > { %1265 = vrot.lane.b32.xlu0 %v2791_v35, %s3058_s12 }
 0x28e   : > { %v2797_v39 = vpop.eup %2796 }
 0x28f   : > { %1263 = vrot.lane.b32.xlu1 %v2793_v8, %s3058_s12 }
 0x290   : > { %v2799_v40 = vpop.eup %2798 }
 0x291   : > { %1269 = vrot.lane.b32.xlu0 %v2795_v10, %s3058_s12 }
 0x292   : > { %v2801_v9 = vpop.eup %2800 }
 0x293   : > { %1267 = vrot.lane.b32.xlu1 %v2797_v39, %s3058_s12  ;;  %v2803_v32 = vpop.eup %2802 }
 0x294   : > { %v400_v45 = vmul.f32 %v2803_v32, %v394_v42 }
 0x295   : > { %1273 = vrot.lane.b32.xlu0 %v2799_v40, %s3058_s12 }
 0x296   : > { %v3578_v46 = vrot.slane %v400_v45, %v1342_v47 }
 0x297   : > { %1271 = vrot.lane.b32.xlu1 %v2801_v9, %s3058_s12  ;;  %s1827_s12 = smul.f32 %s3689_s20, %s3695_s30  ;;  %s3000_s30 = sshll.u32 %s3061_s29, 4  ;;  %s3001_s30 = int_to_ptr.vmem [resolvable:$false] %s3000_s30 }
 0x298   : > { %s3002_s1 = scalar_lea.vmem %s3001_s30, 256 }
 0x2c7   : > { %v1214_v49 = vpop.permute.xlu0 %1213 }
 0x2c8   : > { %v1308_v53 = vmul.f32 %v3445_v3, %v1214_v49 }
 0x2c9   : > { %v1212_v51 = vpop.permute.xlu1 %1211 }
 0x2ca   : > { %v1307_v52 = vmul.f32 %v1212_v51, %v3448_v37  ;;  %v1346_v54 = vmul.f32 %v3578_v46, %v1308_v53 }
 0x2cc   : > { %v1381_v56 = vsel %vm1377_vm2, %v1346_v54, 0.0  ;;  %v1345_v60 = vmul.f32 %v3578_v46, %v1307_v52 }
 0x2cd   : > { %v1218_v57 = vpop.permute.xlu1 %1217  ;;  %1382 = vadd.xlane.f32.xlu0 %v1381_v56 }
 0x2ce   : > { %v1378_v41 = vsel %vm1377_vm2, %v1345_v60, 0.0  ;;  %v1310_v58 = vmul.f32 %v3451_v4, %v1218_v57 }
 0x2cf   : > { %1379 = vadd.xlane.f32.xlu1 %v1378_v41 }
 0x2d0   : > { %v1348_v63 = vmul.f32 %v3578_v46, %v1310_v58 }
 0x2d1   : > { %v1216_v42 = vpop.permute.xlu1 %1215 }
 0x2d2   : > { %v1309_v3 = vmul.f32 %v1216_v42, %v3454_v11  ;;  %v1387_v11 = vsel %vm1377_vm2, %v1348_v63, 0.0 }
 0x2d3   : > { %v1226_v0 = vpop.permute.xlu0 %1225 }
 0x2d4   : > { %v1347_v2 = vmul.f32 %v3578_v46, %v1309_v3  ;;  %v1314_v34 = vmul.f32 %v3459_v16, %v1226_v0 }
 0x2d5   : > { %v1224_v37 = vpop.permute.xlu1 %1223 }
 0x2d6   : > { %v1384_v5 = vsel %vm1377_vm2, %v1347_v2, 0.0  ;;  %v1313_v35 = vmul.f32 %v1224_v37, %v3462_v18 }
 0x2d7   : > { %1385 = vadd.xlane.f32.xlu0 %v1384_v5  ;;  %v1222_v61 = vpop.permute.xlu0 %1221 }
 0x2d8   : > { %v1312_v31 = vmul.f32 %v3457_v14, %v1222_v61  ;;  %v1352_v14 = vmul.f32 %v3578_v46, %v1314_v34 }
 0x2d9   : > { %v1220_v6 = vpop.permute.xlu1 %1219 }
 0x2da   : > { %v1311_v4 = vmul.f32 %v1220_v6, %v3466_v19  ;;  %v1350_v8 = vmul.f32 %v3578_v46, %v1312_v31  ;;  %v1351_v19 = vmul.f32 %v3578_v46, %v1313_v35 }
 0x2db   : > { %1388 = vadd.xlane.f32.xlu0 %v1387_v11  ;;  %v1230_v10 = vpop.permute.xlu0 %1229 }
 0x2dc   : > { %v1349_v39 = vmul.f32 %v3578_v46, %v1311_v4  ;;  %v1316_v40 = vmul.f32 %v3468_v7, %v1230_v10  ;;  %v1393_v18 = vsel %vm1377_vm2, %v1350_v8, 0.0  ;;  %v1396_v49 = vsel %vm1377_vm2, %v1351_v19, 0.0 }
 0x2dd   : > { %v1228_v9 = vpop.permute.xlu1 %1227 }
 0x2de   : > { %v1315_v16 = vmul.f32 %v1228_v9, %v3472_v22  ;;  %v1390_v24 = vsel %vm1377_vm2, %v1349_v39, 0.0  ;;  %v1354_v45 = vmul.f32 %v3578_v46, %v1316_v40  ;;  %v1399_v22 = vsel %vm1377_vm2, %v1352_v14, 0.0 }
 0x2df   : > { %1391 = vadd.xlane.f32.xlu1 %v1390_v24  ;;  %1394 = vadd.xlane.f32.xlu0 %v1393_v18  ;;  %v1234_v26 = vpop.permute.xlu0 %1233 }
 0x2e0   : > { %v1318_v32 = vmul.f32 %v3475_v44, %v1234_v26  ;;  %v1353_v53 = vmul.f32 %v3578_v46, %v1315_v16  ;;  %v1405_v54 = vsel %vm1377_vm2, %v1354_v45, 0.0 }
 0x2e1   : > { %v1232_v47 = vpop.permute.xlu1 %1231 }
 0x2e2   : > { %v1317_v7 = vmul.f32 %v1232_v47, %v3479_v43  ;;  %v1356_v56 = vmul.f32 %v3578_v46, %v1318_v32  ;;  %v1402_v43 = vsel %vm1377_vm2, %v1353_v53, 0.0 }
 0x2e3   : > { %1397 = vadd.xlane.f32.xlu1 %v1396_v49  ;;  %1400 = vadd.xlane.f32.xlu0 %v1399_v22  ;;  %v1238_v51 = vpop.permute.xlu0 %1237 }
 0x2e4   : > { %v1320_v44 = vmul.f32 %v3482_v12, %v1238_v51  ;;  %v1355_v57 = vmul.f32 %v3578_v46, %v1317_v7  ;;  %v1411_v3 = vsel %vm1377_vm2, %v1356_v56, 0.0 }
 0x2e5   : > { %v1236_v52 = vpop.permute.xlu1 %1235 }
 0x2e6   : > { %v1319_v60 = vmul.f32 %v1236_v52, %v3486_v13  ;;  %v1408_v2 = vsel %vm1377_vm2, %v1355_v57, 0.0  ;;  %v1358_v13 = vmul.f32 %v3578_v46, %v1320_v44 }
 0x2e7   : > { %1403 = vadd.xlane.f32.xlu1 %v1402_v43  ;;  %1406 = vadd.xlane.f32.xlu0 %v1405_v54  ;;  %v1242_v41 = vpop.permute.xlu0 %1241 }
 0x2e8   : > { %v1322_v42 = vmul.f32 %v3490_v36, %v1242_v41  ;;  %v1357_v12 = vmul.f32 %v3578_v46, %v1319_v60 }
 0x2e9   : > { %v1240_v58 = vpop.permute.xlu1 %1239 }
 0x2ea   : > { %v1321_v0 = vmul.f32 %v1240_v58, %v3494_v48  ;;  %v1360_v61 = vmul.f32 %v3578_v46, %v1322_v42  ;;  %v1414_v31 = vsel %vm1377_vm2, %v1357_v12, 0.0  ;;  %v1417_v48 = vsel %vm1377_vm2, %v1358_v13, 0.0 }
 0x2eb   : > { %1409 = vadd.xlane.f32.xlu1 %v1408_v2  ;;  %1412 = vadd.xlane.f32.xlu0 %v1411_v3  ;;  %v1246_v37 = vpop.permute.xlu0 %1245 }
 0x2ec   : > { %v1324_v5 = vmul.f32 %v3498_v17, %v1246_v37  ;;  %v1359_v34 = vmul.f32 %v3578_v46, %v1321_v0  ;;  %v1423_v4 = vsel %vm1377_vm2, %v1360_v61, 0.0 }
 0x2ed   : > { %v1244_v63 = vpop.permute.xlu1 %1243 }
 0x2ee   : > { %v1323_v36 = vmul.f32 %v1244_v63, %v3502_v15  ;;  %v1362_v11 = vmul.f32 %v3578_v46, %v1324_v5  ;;  %v1420_v15 = vsel %vm1377_vm2, %v1359_v34, 0.0 }
 0x2ef   : > { %1415 = vadd.xlane.f32.xlu1 %v1414_v31  ;;  %1418 = vadd.xlane.f32.xlu0 %v1417_v48  ;;  %v1250_v6 = vpop.permute.xlu0 %1249 }
 0x2f0   : > { %v1326_v17 = vmul.f32 %v3506_v50, %v1250_v6  ;;  %v1361_v10 = vmul.f32 %v3578_v46, %v1323_v36  ;;  %v1429_v14 = vsel %vm1377_vm2, %v1362_v11, 0.0  ;;  %v1475_v6 = vld [vmem:[%s3680_s17 + $0x8] sm:$0xff] }
 0x2f1   : > { %v1248_v35 = vpop.permute.xlu1 %1247 }
 0x2f2   : > { %v1325_v8 = vmul.f32 %v1248_v35, %v3510_v29  ;;  %v1426_v24 = vsel %vm1377_vm2, %v1361_v10, 0.0  ;;  %v1364_v29 = vmul.f32 %v3578_v46, %v1326_v17  ;;  %v1474_v35 = vld [vmem:[%s3680_s17] sm:$0xff] }
 0x2f3   : > { %1421 = vadd.xlane.f32.xlu1 %v1420_v15  ;;  %1424 = vadd.xlane.f32.xlu0 %v1423_v4  ;;  %v1254_v39 = vpop.permute.xlu0 %1253  ;;  %v3684_v15 = vstv %s388_s19 }
 0x2f4   : > { %v1328_v40 = vmul.f32 %v3514_v20, %v1254_v39  ;;  %v1363_v50 = vmul.f32 %v3578_v46, %v1325_v8 }
 0x2f5   : > { %v1252_v9 = vpop.permute.xlu1 %1251 }
 0x2f6   : > { %v1327_v16 = vmul.f32 %v1252_v9, %v3518_v21  ;;  %v1366_v32 = vmul.f32 %v3578_v46, %v1328_v40  ;;  %v1432_v47 = vsel %vm1377_vm2, %v1363_v50, 0.0  ;;  %v1435_v21 = vsel %vm1377_vm2, %v1364_v29, 0.0 }
 0x2f7   : > { %1427 = vadd.xlane.f32.xlu1 %v1426_v24  ;;  %1430 = vadd.xlane.f32.xlu0 %v1429_v14  ;;  %v1258_v18 = vpop.permute.xlu0 %1257  ;;  %v1476_v14 = vld [vmem:[%s3680_s17 + $0x10] sm:$0xff] }
 0x2f8   : > { %v1330_v19 = vmul.f32 %v3522_v55, %v1258_v18  ;;  %v1365_v45 = vmul.f32 %v3578_v46, %v1327_v16  ;;  %v1441_v22 = vsel %vm1377_vm2, %v1366_v32, 0.0 }
 0x2f9   : > { %v1256_v26 = vpop.permute.xlu1 %1255 }
 0x2fa   : > { %v1329_v20 = vmul.f32 %v1256_v26, %v3526_v59  ;;  %v1368_v53 = vmul.f32 %v3578_v46, %v1330_v19  ;;  %v1438_v59 = vsel %vm1377_vm2, %v1365_v45, 0.0  ;;  %v1477_v19 = vld [vmem:[%s3680_s17 + $0x18] sm:$0xff]  ;;  %v1479_v45 = vld [vmem:[%s3680_s17 + $0x28] sm:$0xff] }
 0x2fb   : > { %1433 = vadd.xlane.f32.xlu1 %v1432_v47  ;;  %1436 = vadd.xlane.f32.xlu0 %v1435_v21  ;;  %v1262_v7 = vpop.permute.xlu0 %1261  ;;  %v1478_v21 = vld [vmem:[%s3680_s17 + $0x20] sm:$0xff] }
 0x2fc   : > { %v1332_v55 = vmul.f32 %v3530_v25, %v1262_v7  ;;  %v1367_v52 = vmul.f32 %v3578_v46, %v1329_v20  ;;  %v1447_v60 = vsel %vm1377_vm2, %v1368_v53, 0.0  ;;  %v3699_v53 = vstv %s2393_s25 }
 0x2fd   : > { %v1260_v49 = vpop.permute.xlu1 %1259 }
 0x2fe   : > { %v1331_v51 = vmul.f32 %v1260_v49, %v3534_v23  ;;  %v1444_v57 = vsel %vm1377_vm2, %v1367_v52, 0.0  ;;  %v1370_v23 = vmul.f32 %v3578_v46, %v1332_v55 }
 0x2ff   : > { %1439 = vadd.xlane.f32.xlu1 %v1438_v59  ;;  %1442 = vadd.xlane.f32.xlu0 %v1441_v22  ;;  %v1266_v54 = vpop.permute.xlu0 %1265  ;;  %v2026_v22 = vadd.s32 8, %v3573_v27 }
 0x300   : > { %v1334_v56 = vmul.f32 %v3538_v62, %v1266_v54  ;;  %v1369_v25 = vmul.f32 %v3578_v46, %v1331_v51  ;;  %v1453_v2 = vsel %vm1377_vm2, %v1370_v23, 0.0 }
 0x301   : > { %v1264_v44 = vpop.permute.xlu1 %1263  ;;  %v3708_v23 = vadd.s32 %v3699_v53, %v2026_v22 }
 0x302   : > { %v1333_v43 = vmul.f32 %v1264_v44, %v3542_v1  ;;  %v1372_v3 = vmul.f32 %v3578_v46, %v1334_v56  ;;  %v1450_v1 = vsel %vm1377_vm2, %v1369_v25, 0.0  ;;  %v1480_v44 = vld [vmem:[%s3680_s17 + $0x30] sm:$0xff]  ;;  %v1481_v25 = vld [vmem:[%s3680_s17 + $0x38] sm:$0xff] }
 0x303   : > { %1445 = vadd.xlane.f32.xlu1 %v1444_v57  ;;  %1448 = vadd.xlane.f32.xlu0 %v1447_v60  ;;  %v1270_v41 = vpop.permute.xlu0 %1269 }
 0x304   : > { %v1371_v58 = vmul.f32 %v3578_v46, %v1333_v43  ;;  %v1336_v62 = vmul.f32 %v3546_v28, %v1270_v41  ;;  %v1459_v5 = vsel %vm1377_vm2, %v1372_v3, 0.0  ;;  %v3710_v41 = vstv %s2090_s24  ;;  %s2233_s24 = scalar_lea.sflag [#allocation7], %s371_s14 }
 0x305   : > { %v1268_v42 = vpop.permute.xlu1 %1267  ;;  %vm2093_vm3 = vcmp.lt.s32.totalorder %v3708_v23, %v3710_v41 }
 0x306   : > { %v1335_v0 = vmul.f32 %v1268_v42, %v3550_v30  ;;  %v1456_v37 = vsel %vm1377_vm2, %v1371_v58, 0.0  ;;  %v1374_v30 = vmul.f32 %v3578_v46, %v1336_v62  ;;  %v2027_v42 = vadd.s32 16, %v3573_v27 }
 0x307   : > { %1451 = vadd.xlane.f32.xlu1 %v1450_v1  ;;  %1454 = vadd.xlane.f32.xlu0 %v1453_v2  ;;  %v1274_v12 = vpop.permute.xlu0 %1273 }
 0x308   : > { %v1338_v63 = vmul.f32 %v3554_v33, %v1274_v12  ;;  %v1373_v28 = vmul.f32 %v3578_v46, %v1335_v0  ;;  %v1465_v31 = vsel %vm1377_vm2, %v1374_v30, 0.0 }
 0x309   : > { %v1272_v13 = vpop.permute.xlu1 %1271 }
 0x30a   : > { %v1337_v61 = vmul.f32 %v1272_v13, %v3560_v38  ;;  %v1462_v36 = vsel %vm1377_vm2, %v1373_v28, 0.0  ;;  %v1376_v34 = vmul.f32 %v3578_v46, %v1338_v63  ;;  %v3713_v13 = vstv %s1828_s13 }
 0x30b   : > { %1457 = vadd.xlane.f32.xlu1 %v1456_v37  ;;  %1460 = vadd.xlane.f32.xlu0 %v1459_v5  ;;  %v3715_v37 = vstv %s1827_s12  ;;  %v3719_v5 = vadd.s32 %v3699_v53, %v3573_v27 }
 0x30c   : > { %v1375_v48 = vmul.f32 %v3578_v46, %v1337_v61  ;;  %v1471_v38 = vsel %vm1377_vm2, %v1376_v34, 0.0  ;;  %v3726_v34 = vadd.s32 %v3699_v53, %v2027_v42 }
 0x30d   : > { %vm2092_vm4 = vcmp.lt.s32.totalorder %v3719_v5, %v3710_v41 }
 0x30e   : > { %v1468_v33 = vsel %vm1377_vm2, %v1375_v48, 0.0  ;;  %vm2094_vm6 = vcmp.lt.s32.totalorder %v3726_v34, %v3710_v41 }
 0x30f   : > { %1463 = vadd.xlane.f32.xlu1 %v1462_v36  ;;  %1466 = vadd.xlane.f32.xlu0 %v1465_v31  ;;  %v1482_v36 = vld [vmem:[%s3680_s17 + $0x40] sm:$0xff]  ;;  %v1483_v31 = vld [vmem:[%s3680_s17 + $0x48] sm:$0xff] }
 0x313   : > { %1469 = vadd.xlane.f32.xlu1 %v1468_v33  ;;  %1472 = vadd.xlane.f32.xlu0 %v1471_v38  ;;  %v2028_v33 = vadd.s32 24, %v3573_v27 }
 0x356   : > { %v1383_v46 = vpop.xlane.xlu0 %1382 }
 0x357   : > { %v1507_v4 = vsub.f32 %v1383_v46, %v1475_v6 }
 0x358   : > { %v1380_v11 = vpop.xlane.xlu1 %1379 }
 0x359   : > { %v1539_v17 = vand.u32 2147483647, %v1507_v4  ;;  %v1506_v8 = vsub.f32 %v1380_v11, %v1474_v35 }
 0x35b   : > { %v1571_v10 = vsub.f32 0.7853982, %v1539_v17  ;;  %v1538_v39 = vand.u32 2147483647, %v1506_v8 }
 0x35d   : > { %v1604_v40 = vmul.f32 %v3684_v15, %v1571_v10  ;;  %v1570_v9 = vsub.f32 0.7853982, %v1538_v39 }
 0x35f   : > { %v2362_v16 = vmul.f32 -1.442695, %v1604_v40  ;;  %v1603_v24 = vmul.f32 %v3684_v15, %v1570_v9  ;;  %v1484_v9 = vld [vmem:[%s3680_s17 + $0x50] sm:$0xff] }
 0x360   : > { %v1386_v50 = vpop.xlane.xlu0 %1385 }
 0x361   : > { %2804 = vpow2.f32 %v2362_v16  ;;  %v2361_v29 = vmul.f32 -1.442695, %v1603_v24  ;;  %v1508_v18 = vsub.f32 %v1386_v50, %v1476_v14  ;;  %v1485_v14 = vld [vmem:[%s3680_s17 + $0x58] sm:$0xff]  ;;  %v2029_v16 = vadd.s32 32, %v3573_v27 }
 0x362   : > { %v2030_v24 = vadd.s32 40, %v3573_v27  ;;  %v2031_v50 = vadd.s32 48, %v3573_v27 }
 0x363   : > { %2806 = vpow2.f32 %v2361_v29  ;;  %v1540_v26 = vand.u32 2147483647, %v1508_v18 }
 0x364   : > { %v1389_v32 = vpop.xlane.xlu0 %1388 }
 0x365   : > { %v1572_v20 = vsub.f32 0.7853982, %v1540_v26  ;;  %v1509_v47 = vsub.f32 %v1389_v32, %v1477_v19 }
 0x367   : > { %v1605_v7 = vmul.f32 %v3684_v15, %v1572_v20  ;;  %v1541_v49 = vand.u32 2147483647, %v1509_v47 }
 0x368   : > { %v1392_v55 = vpop.xlane.xlu1 %1391  ;;  %v1395_v51 = vpop.xlane.xlu0 %1394 }
 0x369   : > { %v2363_v59 = vmul.f32 -1.442695, %v1605_v7  ;;  %v1573_v52 = vsub.f32 0.7853982, %v1541_v49  ;;  %v1510_v54 = vsub.f32 %v1392_v55, %v1478_v21  ;;  %v1511_v56 = vsub.f32 %v1395_v51, %v1479_v45  ;;  %v1486_v45 = vld [vmem:[%s3680_s17 + $0x60] sm:$0xff]  ;;  %v1487_v7 = vld [vmem:[%s3680_s17 + $0x68] sm:$0xff] }
 0x36a   : > { %v3739_v49 = vadd.s32 %v3699_v53, %v2028_v33 }
 0x36b   : > { %2808 = vpow2.f32 %v2363_v59  ;;  %v1606_v60 = vmul.f32 %v3684_v15, %v1573_v52  ;;  %v1542_v43 = vand.u32 2147483647, %v1510_v54  ;;  %v1543_v57 = vand.u32 2147483647, %v1511_v56 }
 0x36c   : > { %v1398_v58 = vpop.xlane.xlu1 %1397  ;;  %v1401_v3 = vpop.xlane.xlu0 %1400  ;;  %v3742_v59 = vadd.s32 %v3699_v53, %v2029_v16  ;;  %vm2095_vm7 = vcmp.lt.s32.totalorder %v3739_v49, %v3710_v41 }
 0x36d   : > { %v2364_v62 = vmul.f32 -1.442695, %v1606_v60  ;;  %v1574_v0 = vsub.f32 0.7853982, %v1542_v43  ;;  %v1575_v1 = vsub.f32 0.7853982, %v1543_v57  ;;  %v1512_v2 = vsub.f32 %v1398_v58, %v1480_v44 }
 0x36e   : > { %v2805_v12 = vpop.eup %2804  ;;  %v1513_v63 = vsub.f32 %v1401_v3, %v1481_v25  ;;  %v3745_v60 = vadd.s32 %v3699_v53, %v2030_v24  ;;  %v2032_v43 = vadd.s32 56, %v3573_v27  ;;  %v1490_v24 = vld [vmem:[%s3680_s17 + $0x80] sm:$0xff]  ;;  %vm2096_vm8 = vcmp.lt.s32.totalorder %v3742_v59, %v3710_v41 }
 0x36f   : > { %v1732_v61 = vadd.f32 1.0, %v2805_v12  ;;  %2810 = vpow2.f32 %v2364_v62  ;;  %v1607_v28 = vmul.f32 %v3684_v15, %v1574_v0  ;;  %v1608_v30 = vmul.f32 %v3684_v15, %v1575_v1 }
 0x370   : > { %v2807_v48 = vpop.eup %2806  ;;  %v1544_v38 = vand.u32 2147483647, %v1512_v2  ;;  %v1545_v6 = vand.u32 2147483647, %v1513_v63  ;;  %v1404_v46 = vpop.xlane.xlu1 %1403  ;;  %v1488_v63 = vld [vmem:[%s3680_s17 + $0x70] sm:$0xff]  ;;  %vm2097_vm9 = vcmp.lt.s32.totalorder %v3745_v60, %v3710_v41 }
 0x371   : > { %v1407_v35 = vpop.xlane.xlu0 %1406  ;;  %2812 = vrcp.f32 %v1732_v61  ;;  %v1731_v4 = vadd.f32 1.0, %v2807_v48  ;;  %v2365_v11 = vmul.f32 -1.442695, %v1607_v28  ;;  %v2366_v17 = vmul.f32 -1.442695, %v1608_v30 }
 0x372   : > { %v1576_v8 = vsub.f32 0.7853982, %v1544_v38  ;;  %v1577_v10 = vsub.f32 0.7853982, %v1545_v6  ;;  %v1514_v39 = vsub.f32 %v1404_v46, %v1482_v36  ;;  %v1515_v40 = vsub.f32 %v1407_v35, %v1483_v31  ;;  %v1489_v36 = vld [vmem:[%s3680_s17 + $0x78] sm:$0xff] }
 0x373   : > { %2814 = vrcp.f32 %v1731_v4  ;;  %v3752_v61 = vadd.s32 %v3699_v53, %v2031_v50 }
 0x374   : > { %2816 = vpow2.f32 %v2365_v11  ;;  %v1609_v29 = vmul.f32 %v3684_v15, %v1576_v8  ;;  %v1610_v18 = vmul.f32 %v3684_v15, %v1577_v10  ;;  %v1546_v19 = vand.u32 2147483647, %v1514_v39  ;;  %v1410_v26 = vpop.xlane.xlu1 %1409 }
 0x375   : > { %v1413_v32 = vpop.xlane.xlu0 %1412  ;;  %2818 = vpow2.f32 %v2366_v17  ;;  %v1547_v20 = vand.u32 2147483647, %v1515_v40  ;;  %v1516_v47 = vsub.f32 %v1410_v26, %v1484_v9  ;;  %vm2098_vm10 = vcmp.lt.s32.totalorder %v3752_v61, %v3710_v41 }
 0x376   : > { %v1517_v21 = vsub.f32 %v1413_v32, %v1485_v14  ;;  %v2367_v22 = vmul.f32 -1.442695, %v1609_v29  ;;  %v2368_v55 = vmul.f32 -1.442695, %v1610_v18  ;;  %v1578_v51 = vsub.f32 0.7853982, %v1546_v19 }
 0x377   : > { %v1579_v52 = vsub.f32 0.7853982, %v1547_v20  ;;  %v1548_v54 = vand.u32 2147483647, %v1516_v47  ;;  %v3759_v14 = vadd.s32 %v3699_v53, %v2032_v43 }
 0x378   : > { %v1549_v56 = vand.u32 2147483647, %v1517_v21  ;;  %v2809_v44 = vpop.eup %2808  ;;  %2820 = vpow2.f32 %v2367_v22  ;;  %v1611_v57 = vmul.f32 %v3684_v15, %v1578_v51  ;;  %v1416_v25 = vpop.xlane.xlu1 %1415  ;;  %v3768_v51 = vadd.s32 64, %v3573_v27 }
 0x379   : > { %v1419_v42 = vpop.xlane.xlu0 %1418  ;;  %v1733_v58 = vadd.f32 1.0, %v2809_v44  ;;  %2822 = vpow2.f32 %v2368_v55  ;;  %v1612_v3 = vmul.f32 %v3684_v15, %v1579_v52  ;;  %v1580_v62 = vsub.f32 0.7853982, %v1548_v54 }
 0x37a   : > { %v2369_v0 = vmul.f32 -1.442695, %v1611_v57  ;;  %v1581_v1 = vsub.f32 0.7853982, %v1549_v56  ;;  %v1518_v2 = vsub.f32 %v1416_v25, %v1486_v45  ;;  %v1519_v12 = vsub.f32 %v1419_v42, %v1487_v7  ;;  %v1491_v7 = vld [vmem:[%s3680_s17 + $0x88] sm:$0xff] }
 0x37b   : > { %2824 = vrcp.f32 %v1733_v58  ;;  %v2370_v28 = vmul.f32 -1.442695, %v1612_v3  ;;  %v1613_v30 = vmul.f32 %v3684_v15, %v1580_v62  ;;  %v1492_v3 = vld [vmem:[%s3680_s17 + $0x90] sm:$0xff]  ;;  %vm2099_vm11 = vcmp.lt.s32.totalorder %v3759_v14, %v3710_v41 }
 0x37c   : > { %v2811_v31 = vpop.eup %2810  ;;  %2826 = vpow2.f32 %v2369_v0  ;;  %v1614_v48 = vmul.f32 %v3684_v15, %v1581_v1  ;;  %v1550_v33 = vand.u32 2147483647, %v1518_v2  ;;  %v1551_v38 = vand.u32 2147483647, %v1519_v12  ;;  %v1422_v6 = vpop.xlane.xlu1 %1421 }
 0x37d   : > { %v1425_v46 = vpop.xlane.xlu0 %1424  ;;  %v1734_v35 = vadd.f32 1.0, %v2811_v31  ;;  %2828 = vpow2.f32 %v2370_v28  ;;  %v2371_v4 = vmul.f32 -1.442695, %v1613_v30  ;;  %v1520_v11 = vsub.f32 %v1422_v6, %v1488_v63  ;;  %v1493_v31 = vld [vmem:[%s3680_s17 + $0x98] sm:$0xff] }
 0x37e   : > { %v2813_v17 = vpop.eup %2812  ;;  %v2372_v8 = vmul.f32 -1.442695, %v1614_v48  ;;  %v1582_v10 = vsub.f32 0.7853982, %v1550_v33  ;;  %v1583_v39 = vsub.f32 0.7853982, %v1551_v38  ;;  %v1521_v40 = vsub.f32 %v1425_v46, %v1489_v36 }
 0x37f   : > { %v1831_v9 = vmul.f32 %v2813_v17, %v3713_v13  ;;  %2830 = vrcp.f32 %v1734_v35  ;;  %v1552_v16 = vand.u32 2147483647, %v1520_v11 }
 0x380   : > { %v2815_v50 = vpop.eup %2814  ;;  %2832 = vpow2.f32 %v2371_v4  ;;  %v1615_v29 = vmul.f32 %v3684_v15, %v1582_v10  ;;  %v1616_v18 = vmul.f32 %v3684_v15, %v1583_v39  ;;  %v1553_v19 = vand.u32 2147483647, %v1521_v40  ;;  %v1428_v26 = vpop.xlane.xlu1 %1427  ;;  %v1494_v40 = vld [vmem:[%s3680_s17 + $0xa0] sm:$0xff] }
 0x381   : > { %v1431_v32 = vpop.xlane.xlu0 %1430  ;;  %v2817_v20 = vpop.eup %2816  ;;  %v1864_v47 = vadd.f32 %v3715_v37, %v1831_v9  ;;  %v1830_v21 = vmul.f32 %v2815_v50, %v3713_v13  ;;  %2834 = vpow2.f32 %v2372_v8  ;;  %v1584_v45 = vsub.f32 0.7853982, %v1552_v16 }
 0x382   : > { %v2819_v22 = vpop.eup %2818  ;;  %v1735_v55 = vadd.f32 1.0, %v2817_v20  ;;  %v2373_v52 = vmul.f32 -1.442695, %v1615_v29  ;;  %v1522_v54 = vsub.f32 %v1428_v26, %v1490_v24  ;;  %v1585_v25 = vsub.f32 0.7853982, %v1553_v19 }
 0x383   : > { %v1896_v56 = vmul.f32 0.99, %v1864_v47  ;;  %v1863_v44 = vadd.f32 %v3715_v37, %v1830_v21  ;;  %v1736_v43 = vadd.f32 1.0, %v2819_v22  ;;  %v1617_v57 = vmul.f32 %v3684_v15, %v1584_v45 }
 0x384   : > { %2836 = vrcp.f32 %v1735_v55  ;;  %v1554_v42 = vand.u32 2147483647, %v1522_v54  ;;  %v1523_v58 = vsub.f32 %v1431_v32, %v1491_v7  ;;  %v1434_v62 = vpop.xlane.xlu1 %1433  ;;  %v2374_v12 = vmul.f32 -1.442695, %v1616_v18 }
 0x385   : > { %v2821_v0 = vpop.eup %2820  ;;  %v1928_v1 = vadd.f32 0.005, %v1896_v56  ;;  %v1895_v2 = vmul.f32 0.99, %v1863_v44  ;;  %2838 = vrcp.f32 %v1736_v43  ;;  %v1618_v30 = vmul.f32 %v3684_v15, %v1585_v25  ;;  %v1437_v48 = vpop.xlane.xlu0 %1436  ;;  %v1495_v43 = vld [vmem:[%s3680_s17 + $0xa8] sm:$0xff] }
 0x386   : > { %v2823_v63 = vpop.eup %2822  ;;  %v1737_v28 = vadd.f32 1.0, %v2821_v0  ;;  %2840 = vpow2.f32 %v2373_v52  ;;  %v1586_v36 = vsub.f32 0.7853982, %v1554_v42  ;;  %v1555_v6 = vand.u32 2147483647, %v1523_v58 }
 0x387   : > { %2842 = vlog2.f32 %v1928_v1  ;;  %v1927_v33 = vadd.f32 0.005, %v1895_v2  ;;  %v1738_v38 = vadd.f32 1.0, %v2823_v63  ;;  %v2375_v35 = vmul.f32 -1.442695, %v1617_v57 }
 0x388   : > { %v2825_v46 = vpop.eup %2824  ;;  %2844 = vrcp.f32 %v1737_v28  ;;  %v1619_v4 = vmul.f32 %v3684_v15, %v1586_v36  ;;  %v1524_v11 = vsub.f32 %v1434_v62, %v1492_v3  ;;  %v1587_v10 = vsub.f32 0.7853982, %v1555_v6  ;;  %v1440_v9 = vpop.xlane.xlu1 %1439 }
 0x389   : > { %v2827_v17 = vpop.eup %2826  ;;  %2846 = vlog2.f32 %v1927_v33  ;;  %v1832_v8 = vmul.f32 %v2825_v46, %v3713_v13  ;;  %v1525_v39 = vsub.f32 %v1437_v48, %v1493_v31  ;;  %v2376_v50 = vmul.f32 -1.442695, %v1618_v30  ;;  %v1443_v57 = vpop.xlane.xlu0 %1442 }
 0x38a   : > { %v2829_v16 = vpop.eup %2828  ;;  %2848 = vrcp.f32 %v1738_v38  ;;  %v1739_v24 = vadd.f32 1.0, %v2827_v17  ;;  %v1556_v29 = vand.u32 2147483647, %v1524_v11  ;;  %v1620_v26 = vmul.f32 %v3684_v15, %v1587_v10  ;;  %v3802_v17 = vld [vmem:[%s3680_s17 + $0xb0] sm:$0xff] }
 0x38b   : > { %v1865_v18 = vadd.f32 %v3715_v37, %v1832_v8  ;;  %v1740_v19 = vadd.f32 1.0, %v2829_v16  ;;  %2850 = vpow2.f32 %v2374_v12  ;;  %v1557_v47 = vand.u32 2147483647, %v1525_v39 }
 0x38c   : > { %v2831_v32 = vpop.eup %2830  ;;  %2852 = vrcp.f32 %v1739_v24  ;;  %v1588_v20 = vsub.f32 0.7853982, %v1556_v29  ;;  %v1526_v21 = vsub.f32 %v1440_v9, %v1494_v40  ;;  %v2377_v55 = vmul.f32 -1.442695, %v1619_v4 }
 0x38d   : > { %v2833_v45 = vpop.eup %2832  ;;  %v1897_v7 = vmul.f32 0.99, %v1865_v18  ;;  %v1833_v22 = vmul.f32 %v2831_v32, %v3713_v13  ;;  %2854 = vrcp.f32 %v1740_v19  ;;  %v1589_v44 = vsub.f32 0.7853982, %v1557_v47 }
 0x38e   : > { %v2835_v52 = vpop.eup %2834  ;;  %v1741_v54 = vadd.f32 1.0, %v2833_v45  ;;  %2856 = vpow2.f32 %v2375_v35  ;;  %v1621_v56 = vmul.f32 %v3684_v15, %v1588_v20  ;;  %v3789_v3 = vadd.s32 72, %v3573_v27 }
 0x38f   : > { %v1929_v25 = vadd.f32 0.005, %v1897_v7  ;;  %v1866_v42 = vadd.f32 %v3715_v37, %v1833_v22  ;;  %v1742_v58 = vadd.f32 1.0, %v2835_v52  ;;  %2858 = vpow2.f32 %v2376_v50 }
 0x390   : > { %2860 = vrcp.f32 %v1741_v54  ;;  %v2378_v62 = vmul.f32 -1.442695, %v1620_v26  ;;  %v1558_v0 = vand.u32 2147483647, %v1526_v21  ;;  %v1622_v12 = vmul.f32 %v3684_v15, %v1589_v44 }
 0x391   : > { %v2837_v1 = vpop.eup %2836  ;;  %2862 = vlog2.f32 %v1929_v25  ;;  %v1898_v2 = vmul.f32 0.99, %v1866_v42  ;;  %v1527_v63 = vsub.f32 %v1443_v57, %v1495_v43  ;;  %v3795_v36 = vadd.s32 %v3699_v53, %v3768_v51  ;;  %v3804_v51 = vpop.xlane.xlu1 %1445 }
 0x392   : > { %v2839_v28 = vpop.eup %2838  ;;  %v1834_v30 = vmul.f32 %v2837_v1, %v3713_v13  ;;  %2864 = vrcp.f32 %v1742_v58  ;;  %v1590_v31 = vsub.f32 0.7853982, %v1558_v0  ;;  %v2379_v6 = vmul.f32 -1.442695, %v1621_v56 }
 0x393   : > { %v2841_v48 = vpop.eup %2840  ;;  %v1930_v33 = vadd.f32 0.005, %v1898_v2  ;;  %v1835_v38 = vmul.f32 %v2839_v28, %v3713_v13  ;;  %2866 = vpow2.f32 %v2377_v55  ;;  %v3799_v11 = vand.u32 2147483647, %v1527_v63 }
 0x394   : > { %v2843_v46 = vpop.eup %2842  ;;  %v1867_v35 = vadd.f32 %v3715_v37, %v1834_v30  ;;  %v1743_v4 = vadd.f32 1.0, %v2841_v48  ;;  %2868 = vpow2.f32 %v2378_v62  ;;  %v2380_v39 = vmul.f32 -1.442695, %v1622_v12 }
 0x395   : > { %v2845_v8 = vpop.eup %2844  ;;  %2870 = vlog2.f32 %v1930_v33  ;;  %v1868_v10 = vadd.f32 %v3715_v37, %v1835_v38  ;;  %v1623_v40 = vmul.f32 %v3684_v15, %v1590_v31  ;;  %v1962_v16 = vmul.f32 0.6931472, %v2843_v46 }
 0x396   : > { %v2847_v9 = vpop.eup %2846  ;;  %v1899_v24 = vmul.f32 0.99, %v1867_v35  ;;  %v1836_v50 = vmul.f32 %v2845_v8, %v3713_v13  ;;  %2872 = vrcp.f32 %v1743_v4  ;;  %v1528_v26 = vsub.f32 %v3804_v51, %v3802_v17 }
 0x397   : > { %v2849_v29 = vpop.eup %2848  ;;  %v1960_v18 = vmul.f32 0.6931472, %v2847_v9  ;;  %v1900_v19 = vmul.f32 0.99, %v1868_v10  ;;  %2874 = vpow2.f32 %v2379_v6  ;;  %v1591_v45 = vsub.f32 0.7853982, %v3799_v11 }
 0x398   : > { %v2851_v32 = vpop.eup %2850  ;;  %v1931_v20 = vadd.f32 0.005, %v1899_v24  ;;  %v1869_v47 = vadd.f32 %v3715_v37, %v1836_v50  ;;  %v1837_v21 = vmul.f32 %v2849_v29, %v3713_v13  ;;  %2876 = vpow2.f32 %v2380_v39 }
 0x399   : > { %v2853_v7 = vpop.eup %2852  ;;  %v1932_v22 = vadd.f32 0.005, %v1900_v19  ;;  %v1744_v55 = vadd.f32 1.0, %v2851_v32  ;;  %v2381_v52 = vmul.f32 -1.442695, %v1623_v40  ;;  %v2125_v56 = vsel %vm2093_vm3, %v1962_v16, 0.0 }
 0x39a   : > { %v2855_v54 = vpop.eup %2854  ;;  %2878 = vlog2.f32 %v1931_v20  ;;  %v1901_v44 = vmul.f32 0.99, %v1869_v47  ;;  %v1870_v43 = vadd.f32 %v3715_v37, %v1837_v21  ;;  %v2124_v25 = vsel %vm2092_vm4, %v1960_v18, 0.0 }
 0x39b   : > { %v2857_v57 = vpop.eup %2856  ;;  %2880 = vlog2.f32 %v1932_v22  ;;  %v1838_v42 = vmul.f32 %v2853_v7, %v3713_v13  ;;  %v1839_v58 = vmul.f32 %v2855_v54, %v3713_v13  ;;  %v2158_v5 = vsel %vm2156_vm5, %v2125_v56, 0.0 }
 0x39c   : > { %v2859_v62 = vpop.eup %2858  ;;  %v1933_v23 = vadd.f32 0.005, %v1901_v44  ;;  %v1902_v0 = vmul.f32 0.99, %v1870_v43  ;;  %2882 = vrcp.f32 %v1744_v55  ;;  %v1745_v1 = vadd.f32 1.0, %v2857_v57 }
 0x39d   : > { %v2861_v2 = vpop.eup %2860  ;;  %v1871_v12 = vadd.f32 %v3715_v37, %v1838_v42  ;;  %v1872_v63 = vadd.f32 %v3715_v37, %v1839_v58  ;;  %v1746_v28 = vadd.f32 1.0, %v2859_v62  ;;  %2884 = vpow2.f32 %v2381_v52 }
 0x39e   : > { %v2863_v30 = vpop.eup %2862  ;;  %2886 = vlog2.f32 %v1933_v23  ;;  %v1934_v31 = vadd.f32 0.005, %v1902_v0  ;;  %v1840_v48 = vmul.f32 %v2861_v2, %v3713_v13  ;;  %v2157_v4 = vsel %vm2156_vm5, %v2124_v25, 0.0  ;;  %v1497_v23 = vld [vmem:[%s3680_s17 + $0xb8] sm:$0xff]  ;;  %v1449_v0 = vpop.xlane.xlu0 %1448 }
 0x39f   : > { %v2865_v33 = vpop.eup %2864  ;;  %v1964_v38 = vmul.f32 0.6931472, %v2863_v30  ;;  %v1903_v6 = vmul.f32 0.99, %v1871_v12  ;;  %v1904_v46 = vmul.f32 0.99, %v1872_v63  ;;  %2888 = vrcp.f32 %v1745_v1 }
 0x3a0   : > { %v2867_v35 = vpop.eup %2866  ;;  %2890 = vlog2.f32 %v1934_v31  ;;  %v1873_v11 = vadd.f32 %v3715_v37, %v1840_v48  ;;  %v1841_v8 = vmul.f32 %v2865_v33, %v3713_v13  ;;  %v1624_v18 = vmul.f32 %v3684_v15, %v1591_v45 }
 0x3a1   : > { %v2869_v10 = vpop.eup %2868  ;;  %v2126_v39 = vsel %vm2094_vm6, %v1964_v38, 0.0  ;;  %v1935_v40 = vadd.f32 0.005, %v1903_v6  ;;  %v1936_v9 = vadd.f32 0.005, %v1904_v46  ;;  %2892 = vrcp.f32 %v1746_v28 }
 0x3a2   : > { %v2871_v16 = vpop.eup %2870  ;;  %v1905_v24 = vmul.f32 0.99, %v1873_v11  ;;  %v1874_v50 = vadd.f32 %v3715_v37, %v1841_v8  ;;  %v1747_v29 = vadd.f32 1.0, %v2867_v35  ;;  %v2160_v32 = vsel %vm2156_vm5, %v2126_v39, 0.0 }
 0x3a3   : > { %v2873_v19 = vpop.eup %2872  ;;  %v1966_v20 = vmul.f32 0.6931472, %v2871_v16  ;;  %2894 = vlog2.f32 %v1935_v40  ;;  %v1748_v34 = vadd.f32 1.0, %v2869_v10  ;;  %v1560_v52 = vand.u32 2147483647, %v1528_v26 }
 0x3a4   : > { %v2875_v47 = vpop.eup %2874  ;;  %2896 = vlog2.f32 %v1936_v9  ;;  %v1937_v21 = vadd.f32 0.005, %v1905_v24  ;;  %v1906_v7 = vmul.f32 0.99, %v1874_v50  ;;  %v1842_v22 = vmul.f32 %v2873_v19, %v3713_v13 }
 0x3a5   : > { %v2127_v55 = vsel %vm2095_vm7, %v1966_v20, 0.0  ;;  %2898 = vrcp.f32 %v1747_v29  ;;  %v1749_v45 = vadd.f32 1.0, %v2875_v47  ;;  %v2877_v54 = vpop.eup %2876  ;;  %v2159_v56 = vadd.f32 %v2158_v5, %v2157_v4 }
 0x3a6   : > { %v2035_v44 = vadd.s32 80, %v3573_v27  ;;  %v1938_v43 = vadd.f32 0.005, %v1906_v7  ;;  %v1875_v57 = vadd.f32 %v3715_v37, %v1842_v22  ;;  %v2162_v49 = vsel %vm2156_vm5, %v2127_v55, 0.0 }
 0x3a7   : > { %v2879_v25 = vpop.eup %2878  ;;  %2900 = vlog2.f32 %v1937_v21  ;;  %v2382_v42 = vmul.f32 -1.442695, %v1624_v18  ;;  %v1592_v58 = vsub.f32 0.7853982, %v1560_v52  ;;  %v2161_v17 = vadd.f32 %v2160_v32, %v2159_v56 }
 0x3a8   : > { %v2881_v62 = vpop.eup %2880  ;;  %v1968_v51 = vmul.f32 0.6931472, %v2879_v25  ;;  %v1907_v26 = vmul.f32 0.99, %v1875_v57  ;;  %2902 = vrcp.f32 %v1748_v34  ;;  %v1750_v12 = vadd.f32 1.0, %v2877_v54 }
 0x3a9   : > { %v2883_v1 = vpop.eup %2882  ;;  %v1970_v2 = vmul.f32 0.6931472, %v2881_v62  ;;  %2904 = vrcp.f32 %v1749_v45  ;;  %v1625_v63 = vmul.f32 %v3684_v15, %v1592_v58  ;;  %v2163_v30 = vadd.f32 %v2162_v49, %v2161_v17  ;;  %v3886_v45 = vpop.xlane.xlu1 %1451 }
 0x3aa   : > { %v2885_v28 = vpop.eup %2884  ;;  %v2128_v5 = vsel %vm2096_vm8, %v1968_v51, 0.0  ;;  %2906 = vlog2.f32 %v1938_v43  ;;  %v1843_v31 = vmul.f32 %v2883_v1, %v3713_v13  ;;  %v1529_v6 = vsub.f32 %v1449_v0, %v1497_v23  ;;  %v1455_v1 = vpop.xlane.xlu0 %1454 }
 0x3ab   : > { %v2887_v48 = vpop.eup %2886  ;;  %v2164_v33 = vsel %vm2156_vm5, %v2128_v5, 0.0  ;;  %v2129_v38 = vsel %vm2097_vm9, %v1970_v2, 0.0  ;;  %2908 = vpow2.f32 %v2382_v42  ;;  %v2036_v11 = vadd.s32 88, %v3573_v27  ;;  %v1498_v5 = vld [vmem:[%s3680_s17 + $0xc0] sm:$0xff] }
 0x3ac   : > { %v2889_v46 = vpop.eup %2888  ;;  %v2165_v35 = vadd.f32 %v2164_v33, %v2163_v30  ;;  %v1972_v4 = vmul.f32 0.6931472, %v2887_v48  ;;  %v1939_v8 = vadd.f32 0.005, %v1907_v26  ;;  %v2166_v10 = vsel %vm2156_vm5, %v2129_v38, 0.0 }
 0x3ad   : > { %v2891_v59 = vpop.eup %2890  ;;  %v1844_v39 = vmul.f32 %v2889_v46, %v3713_v13  ;;  %2910 = vrcp.f32 %v1750_v12  ;;  %v2383_v40 = vmul.f32 -1.442695, %v1625_v63  ;;  %v1876_v50 = vadd.f32 %v3715_v37, %v1843_v31  ;;  %v1458_v31 = vpop.xlane.xlu1 %1457 }
 0x3ae   : > { %v2893_v9 = vpop.eup %2892  ;;  %v2167_v16 = vadd.f32 %v2166_v10, %v2165_v35  ;;  %v2130_v60 = vsel %vm2098_vm10, %v1972_v4, 0.0  ;;  %v1974_v24 = vmul.f32 0.6931472, %v2891_v59  ;;  %v1561_v32 = vand.u32 2147483647, %v1529_v6 }
 0x3af   : > { %v2168_v29 = vsel %vm2156_vm5, %v2130_v60, 0.0  ;;  %v1877_v18 = vadd.f32 %v3715_v37, %v1844_v39  ;;  %v1845_v19 = vmul.f32 %v2893_v9, %v3713_v13  ;;  %vm2100_vm12 = vcmp.lt.s32.totalorder %v3795_v36, %v3710_v41 }
 0x3b0   : > { %v2895_v20 = vpop.eup %2894  ;;  %v2067_v34 = vadd.s32 %v3699_v53, %v3789_v3  ;;  %v1751_v47 = vadd.f32 1.0, %v2885_v28  ;;  %2912 = vpow2.f32 %v2383_v40  ;;  %v2169_v21 = vadd.f32 %v2168_v29, %v2167_v16 }
 0x3b1   : > { %v2897_v61 = vpop.eup %2896  ;;  %v2131_v7 = vsel %vm2099_vm11, %v1974_v24, 0.0  ;;  %v1976_v22 = vmul.f32 0.6931472, %v2895_v20  ;;  %v2068_v55 = vadd.s32 %v3699_v53, %v2035_v44  ;;  %v3889_v54 = vadd.s32 %v3699_v53, %v2036_v11 }
 0x3b2   : > { %v2899_v52 = vpop.eup %2898  ;;  %v2037_v36 = vadd.s32 96, %v3573_v27  ;;  %v1908_v3 = vmul.f32 0.99, %v1876_v50  ;;  %v1878_v56 = vadd.f32 %v3715_v37, %v1845_v19  ;;  %2914 = vlog2.f32 %v1939_v8  ;;  %v1461_v19 = vpop.xlane.xlu0 %1460 }
 0x3b3   : > { %v2132_v43 = vsel %vm2100_vm12, %v1976_v22, 0.0  ;;  %v1909_v57 = vmul.f32 0.99, %v1877_v18  ;;  %v1593_v25 = vsub.f32 0.7853982, %v1561_v32  ;;  %v2170_v49 = vsel %vm2156_vm5, %v2131_v7, 0.0  ;;  %v1464_v22 = vpop.xlane.xlu1 %1463 }
 0x3b4   : > { %v2901_v14 = vpop.eup %2900  ;;  %v1978_v42 = vmul.f32 0.6931472, %v2897_v61  ;;  %v2038_v44 = vadd.s32 104, %v3573_v27  ;;  %2916 = vrcp.f32 %v1751_v47  ;;  %v2171_v62 = vadd.f32 %v2170_v49, %v2169_v21  ;;  %v1499_v18 = vld [vmem:[%s3680_s17 + $0xc8] sm:$0xff]  ;;  %v1500_v61 = vld [vmem:[%s3680_s17 + $0xd0] sm:$0xff]  ;;  %v1501_v21 = vld [vmem:[%s3680_s17 + $0xd8] sm:$0xff] }
 0x3b5   : > { %v2903_v58 = vpop.eup %2902  ;;  %vm2101_vm13 = vcmp.lt.s32.totalorder %v2067_v34, %v3710_v41  ;;  %vm2102_vm14 = vcmp.lt.s32.totalorder %v2068_v55, %v3710_v41  ;;  %v1846_v17 = vmul.f32 %v2899_v52, %v3713_v13  ;;  %v2172_v26 = vsel %vm2156_vm5, %v2132_v43, 0.0  ;;  %v1502_v7 = vld [vmem:[%s3680_s17 + $0xe0] sm:$0xff] }
 0x3b6   : > { %v2905_v51 = vpop.eup %2904  ;;  %vm2103_vm15 = vcmp.lt.s32.totalorder %v3889_v54, %v3710_v41  ;;  %v1940_v23 = vadd.f32 0.005, %v1908_v3  ;;  %v1910_v0 = vmul.f32 0.99, %v1878_v56  ;;  %v1980_v12 = vmul.f32 0.6931472, %v2901_v14 }
 0x3b7   : > { %v2907_v2 = vpop.eup %2906  ;;  %v3902_v63 = vadd.s32 %v3699_v53, %v2037_v36  ;;  %v1941_v28 = vadd.f32 0.005, %v1909_v57  ;;  %v1626_v30 = vmul.f32 %v3684_v15, %v1593_v25  ;;  %v2133_v33 = vsel %vm2101_vm13, %v1978_v42, 0.0 }
 0x3b8   : > { %v2909_v48 = vpop.eup %2908  ;;  %v3909_v38 = vadd.s32 %v3699_v53, %v2038_v44  ;;  %v2039_v6 = vadd.s32 112, %v3573_v27  ;;  %v1847_v46 = vmul.f32 %v2903_v58, %v3713_v13  ;;  %v2173_v35 = vadd.f32 %v2172_v26, %v2171_v62  ;;  %v1503_v44 = vld [vmem:[%s3680_s17 + $0xe8] sm:$0xff] }
 0x3b9   : > { %v1879_v4 = vadd.f32 %v3715_v37, %v1846_v17  ;;  %v1848_v11 = vmul.f32 %v2905_v51, %v3713_v13  ;;  %v1752_v8 = vadd.f32 1.0, %v2909_v48  ;;  %2918 = vlog2.f32 %v1940_v23 }
 0x3ba   : > { %v2911_v59 = vpop.eup %2910  ;;  %v3916_v10 = vadd.s32 120, %v3573_v27  ;;  %v1942_v39 = vadd.f32 0.005, %v1910_v0  ;;  %v1530_v40 = vsub.f32 %v3886_v45, %v1498_v5  ;;  %v2134_v9 = vsel %vm2102_vm14, %v1980_v12, 0.0 }
 0x3bb   : > { %v1982_v16 = vmul.f32 0.6931472, %v2907_v2  ;;  %2920 = vlog2.f32 %v1941_v28  ;;  %v2384_v60 = vmul.f32 -1.442695, %v1626_v30  ;;  %v2174_v24 = vsel %vm2156_vm5, %v2133_v33, 0.0  ;;  %v1467_v2 = vpop.xlane.xlu0 %1466 }
 0x3bc   : > { %vm2104_vm0 = vcmp.lt.s32.totalorder %v3902_v63, %v3710_v41  ;;  %v3925_v50 = vadd.s32 %v3699_v53, %v2039_v6  ;;  %v1880_v29 = vadd.f32 %v3715_v37, %v1847_v46  ;;  %2922 = vrcp.f32 %v1752_v8 }
 0x3bd   : > { %v2913_v32 = vpop.eup %2912  ;;  %v2175_v20 = vadd.f32 %v2174_v24, %v2173_v35  ;;  %v1911_v34 = vmul.f32 0.99, %v1879_v4  ;;  %v1881_v47 = vadd.f32 %v3715_v37, %v1848_v11  ;;  %2924 = vpow2.f32 %v2384_v60  ;;  %v1504_v60 = vld [vmem:[%s3680_s17 + $0xf0] sm:$0xff]  ;;  %v1470_v24 = vpop.xlane.xlu1 %1469 }
 0x3be   : > { %v2176_v55 = vsel %vm2156_vm5, %v2134_v9, 0.0  ;;  %2926 = vlog2.f32 %v1942_v39  ;;  %v3935_v45 = vadd.s32 128, %v3573_v27  ;;  %v1753_v52 = vadd.f32 1.0, %v2913_v32 }
 0x3bf   : > { %v2135_v36 = vsel %vm2103_vm15, %v1982_v16, 0.0  ;;  %v1849_v3 = vmul.f32 %v2911_v59, %v3713_v13  ;;  %v1562_v56 = vand.u32 2147483647, %v1530_v40  ;;  %v1531_v43 = vsub.f32 %v1455_v1, %v1499_v18  ;;  %v2915_v57 = vpop.eup %2914 }
 0x3c0   : > { %v1912_v25 = vmul.f32 0.99, %v1880_v29  ;;  %v1532_v14 = vsub.f32 %v1458_v31, %v1500_v61  ;;  %v1533_v49 = vsub.f32 %v1461_v19, %v1501_v21  ;;  %v1534_v42 = vsub.f32 %v1464_v22, %v1502_v7 }
 0x3c1   : > { %v2917_v58 = vpop.eup %2916  ;;  %v2177_v62 = vadd.f32 %v2176_v55, %v2175_v20  ;;  %v1943_v17 = vadd.f32 0.005, %v1911_v34  ;;  %v1913_v51 = vmul.f32 0.99, %v1881_v47  ;;  %v1594_v26 = vsub.f32 0.7853982, %v1562_v56 }
 0x3c2   : > { %2928 = vrcp.f32 %v1753_v52  ;;  %v1563_v23 = vand.u32 2147483647, %v1531_v43  ;;  %v1564_v0 = vand.u32 2147483647, %v1532_v14  ;;  %v1565_v54 = vand.u32 2147483647, %v1533_v49  ;;  %v1473_v52 = vpop.xlane.xlu0 %1472 }
 0x3c3   : > { %v1984_v12 = vmul.f32 0.6931472, %v2915_v57  ;;  %v1882_v28 = vadd.f32 %v3715_v37, %v1849_v3  ;;  %v1627_v1 = vmul.f32 %v3684_v15, %v1594_v26  ;;  %v1566_v30 = vand.u32 2147483647, %v1534_v42  ;;  %v1505_v55 = vld [vmem:[%s3680_s17 + $0xf8] sm:$0xff]  ;;  %s373_s17 = scalar_lea.vmem [#allocation6], %s2321_s15 }
 0x3c4   : > { %v2178_v5 = vsel %vm2156_vm5, %v2135_v36, 0.0  ;;  %v1944_v31 = vadd.f32 0.005, %v1912_v25  ;;  %v1850_v48 = vmul.f32 %v2917_v58, %v3713_v13  ;;  %v1595_v33 = vsub.f32 0.7853982, %v1563_v23  ;;  %s2246_s18 = sshll.u32 %s373_s17, 4  ;;  %s2247_s18 = int_to_ptr.vmem [resolvable:$true] %s2246_s18 }
 0x3c5   : > { %v1945_v6 = vadd.f32 0.005, %v1913_v51  ;;  %v2385_v46 = vmul.f32 -1.442695, %v1627_v1  ;;  %v1596_v35 = vsub.f32 0.7853982, %v1564_v0  ;;  %v1535_v4 = vsub.f32 %v1467_v2, %v1503_v44  ;;  %p3003_p0 = scmp.lt.s32.totalorder %s2247_s18, %s3001_s30 }
 0x3c6   : > { %2930 = vlog2.f32 %v1943_v17  ;;  %v1628_v11 = vmul.f32 %v3684_v15, %v1595_v33  ;;  %v1597_v8 = vsub.f32 0.7853982, %v1565_v54  ;;  %v1598_v59 = vsub.f32 0.7853982, %v1566_v30  ;;  %v2919_v39 = vpop.eup %2918  ;;  %s2996_s25 = scalar_lea.vmem %s2247_s18, 128 }
 0x3c7   : > { %v2136_v40 = vsel %vm2104_vm0, %v1984_v12, 0.0  ;;  %v1914_v9 = vmul.f32 0.99, %v1882_v28  ;;  %2932 = vpow2.f32 %v2385_v46  ;;  %v1629_v16 = vmul.f32 %v3684_v15, %v1596_v35  ;;  %p2997_p11 = scmp.ne.s32.totalorder %s2247_s18, %s2996_s25  ;;  %p3004_p1 = scmp.lt.s32.totalorder %s3002_s1, %s2996_s25 }
 0x3c8   : > { %v2921_v29 = vpop.eup %2920  ;;  %vm2105_vm1 = vcmp.lt.s32.totalorder %v3909_v38, %v3710_v41  ;;  %2934 = vlog2.f32 %v1944_v31  ;;  %v1883_v18 = vadd.f32 %v3715_v37, %v1850_v48  ;;  %v2386_v19 = vmul.f32 -1.442695, %v1628_v11 }
 0x3c9   : > { %v1630_v32 = vmul.f32 %v3684_v15, %v1597_v8  ;;  %v2923_v20 = vpop.eup %2922  ;;  %2936 = vlog2.f32 %v1945_v6  ;;  %v2387_v63 = vmul.f32 -1.442695, %v1629_v16  ;;  %v1631_v34 = vmul.f32 %v3684_v15, %v1598_v59  ;;  %p2998_p12 = pnand %p2997_p11, %p3167_p5  ;;  %p3005_p2 = por %p3004_p1, %p3003_p0 }
 0x3ca   : > { %v1567_v47 = vand.u32 2147483647, %v1535_v4  ;;  %v2925_v61 = vpop.eup %2924  ;;  %v1851_v21 = vmul.f32 %v2923_v20, %v3713_v13  ;;  %2938 = vpow2.f32 %v2386_v19  ;;  %v1536_v22 = vsub.f32 %v1470_v24, %v1504_v60 }
 0x3cb   : > { %v2388_v7 = vmul.f32 -1.442695, %v1630_v32  ;;  %v2927_v36 = vpop.eup %2926  ;;  %v2179_v3 = vadd.f32 %v2178_v5, %v2177_v62  ;;  %v1754_v56 = vadd.f32 1.0, %v2925_v61  ;;  %2940 = vpow2.f32 %v2387_v63  ;;  %p2999_p13 = pneg %p2998_p12 }
 0x3cc   : > { %v2389_v43 = vmul.f32 -1.442695, %v1631_v34  ;;  %v1915_v57 = vmul.f32 0.99, %v1883_v18  ;;  %v1884_v25 = vadd.f32 %v3715_v37, %v1851_v21  ;;  %v1599_v14 = vsub.f32 0.7853982, %v1567_v47 }
 0x3cd   : > { %2942 = vpow2.f32 %v2388_v7  ;;  %v2180_v49 = vsel %vm2156_vm5, %v2136_v40, 0.0  ;;  %v1568_v42 = vand.u32 2147483647, %v1536_v22  ;;  %v1537_v44 = vsub.f32 %v1473_v52, %v1505_v55  ;;  %p3006_p3 = pnand %p3005_p2, %p2999_p13 }
 0x3ce   : > { %2944 = vrcp.f32 %v1754_v56  ;;  %v1946_v58 = vadd.f32 0.005, %v1914_v9  ;;  %v1916_v17 = vmul.f32 0.99, %v1884_v25  ;;  %v1632_v51 = vmul.f32 %v3684_v15, %v1599_v14 }
 0x3cf   : > { %2946 = vpow2.f32 %v2389_v43  ;;  %v2929_v26 = vpop.eup %2928  ;;  %v1986_v62 = vmul.f32 0.6931472, %v2919_v39  ;;  %v2073_v23 = vadd.s32 %v3699_v53, %v3916_v10  ;;  %v1600_v0 = vsub.f32 0.7853982, %v1568_v42 }
 0x3d0   : > { %v1569_v54 = vand.u32 2147483647, %v1537_v44  ;;  %vm2106_vm2 = vcmp.lt.s32.totalorder %v3925_v50, %v3710_v41  ;;  %v1947_v2 = vadd.f32 0.005, %v1915_v57  ;;  %v1852_v12 = vmul.f32 %v2929_v26, %v3713_v13 }
 0x3d1   : > { %v2390_v28 = vmul.f32 -1.442695, %v1632_v51  ;;  %v1988_v1 = vmul.f32 0.6931472, %v2921_v29  ;;  %v2074_v30 = vadd.s32 %v3699_v53, %v3935_v45  ;;  %v1633_v5 = vmul.f32 %v3684_v15, %v1600_v0 }
 0x3d2   : > { %v1601_v31 = vsub.f32 0.7853982, %v1569_v54  ;;  %v2181_v48 = vadd.f32 %v2180_v49, %v2179_v3  ;;  %2948 = vlog2.f32 %v1946_v58  ;;  %v1948_v33 = vadd.f32 0.005, %v1916_v17 }
 0x3d3   : > { %v1885_v10 = vadd.f32 %v3715_v37, %v1852_v12  ;;  %v2931_v6 = vpop.eup %2930  ;;  %v2137_v46 = vsel %vm2105_vm1, %v1986_v62, 0.0  ;;  %2950 = vpow2.f32 %v2390_v28  ;;  %v2391_v35 = vmul.f32 -1.442695, %v1633_v5 }
 0x3d4   : > { %v1634_v4 = vmul.f32 %v3684_v15, %v1601_v31  ;;  %v2933_v11 = vpop.eup %2932  ;;  %2952 = vlog2.f32 %v1947_v2  ;;  %v2042_v8 = vadd.s32 136, %v3573_v27  ;;  %v2043_v59 = vadd.s32 144, %v3573_v27 }
 0x3d5   : > { %v1917_v45 = vmul.f32 0.99, %v1885_v10  ;;  %v2935_v39 = vpop.eup %2934  ;;  %v2138_v40 = vsel %vm2106_vm2, %v1988_v1, 0.0  ;;  %v1755_v9 = vadd.f32 1.0, %v2933_v11  ;;  %2954 = vpow2.f32 %v2391_v35 }
 0x3d6   : > { %v2392_v38 = vmul.f32 -1.442695, %v1634_v4  ;;  %v2937_v16 = vpop.eup %2936  ;;  %v2182_v60 = vsel %vm2156_vm5, %v2137_v46, 0.0  ;;  %2956 = vlog2.f32 %v1948_v33  ;;  %vm2107_vm3 = vcmp.lt.s32.totalorder %v2073_v23, %v3710_v41 }
 0x3d7   : > { %v1949_v15 = vadd.f32 0.005, %v1917_v45  ;;  %v2939_v24 = vpop.eup %2938  ;;  %v2183_v29 = vadd.f32 %v2182_v60, %v2181_v48  ;;  %v1990_v18 = vmul.f32 0.6931472, %v2927_v36  ;;  %2958 = vrcp.f32 %v1755_v9 }
 0x3d8   : > { %v2941_v19 = vpop.eup %2940  ;;  %v2184_v32 = vsel %vm2156_vm5, %v2138_v40, 0.0  ;;  %vm2108_vm4 = vcmp.lt.s32.totalorder %v2074_v30, %v3710_v41  ;;  %v1756_v50 = vadd.f32 1.0, %v2939_v24  ;;  %v2075_v34 = vadd.s32 %v3699_v53, %v2042_v8 }
 0x3d9   : > { %2960 = vlog2.f32 %v1949_v15  ;;  %v1757_v63 = vadd.f32 1.0, %v2941_v19  ;;  %v2076_v47 = vadd.s32 %v3699_v53, %v2043_v59  ;;  %v1992_v21 = vmul.f32 0.6931472, %v2931_v6 }
 0x3da   : > { %v2943_v20 = vpop.eup %2942  ;;  %2962 = vpow2.f32 %v2392_v38  ;;  %v2044_v22 = vadd.s32 152, %v3573_v27  ;;  %v2185_v52 = vadd.f32 %v2184_v32, %v2183_v29  ;;  %v2139_v36 = vsel %vm2107_vm3, %v1990_v18, 0.0 }
 0x3db   : > { %v2945_v61 = vpop.eup %2944  ;;  %2964 = vrcp.f32 %v1756_v50  ;;  %v1758_v7 = vadd.f32 1.0, %v2943_v20  ;;  %v1994_v56 = vmul.f32 0.6931472, %v2935_v39  ;;  %v1996_v43 = vmul.f32 0.6931472, %v2937_v16 }
 0x3dc   : > { %v2947_v55 = vpop.eup %2946  ;;  %v1853_v3 = vmul.f32 %v2945_v61, %v3713_v13  ;;  %2966 = vrcp.f32 %v1757_v63  ;;  %v2045_v14 = vadd.s32 160, %v3573_v27  ;;  %vm2109_vm6 = vcmp.lt.s32.totalorder %v2075_v34, %v3710_v41 }
 0x3dd   : > { %2968 = vrcp.f32 %v1758_v7  ;;  %v1759_v57 = vadd.f32 1.0, %v2947_v55  ;;  %vm2110_vm7 = vcmp.lt.s32.totalorder %v2076_v47, %v3710_v41  ;;  %v2140_v49 = vsel %vm2108_vm4, %v1992_v21, 0.0 }
 0x3de   : > { %v1886_v25 = vadd.f32 %v3715_v37, %v1853_v3  ;;  %v2077_v42 = vadd.s32 %v3699_v53, %v2044_v22  ;;  %v2186_v58 = vsel %vm2156_vm5, %v2139_v36, 0.0  ;;  %v2141_v26 = vsel %vm2109_vm6, %v1994_v56, 0.0 }
 0x3df   : > { %2970 = vrcp.f32 %v1759_v57  ;;  %v2949_v44 = vpop.eup %2948  ;;  %v2142_v62 = vsel %vm2110_vm7, %v1996_v43, 0.0  ;;  %v2187_v23 = vadd.f32 %v2186_v58, %v2185_v52  ;;  %v2078_v12 = vadd.s32 %v3699_v53, %v2045_v14 }
 0x3e0   : > { %v1918_v17 = vmul.f32 0.99, %v1886_v25  ;;  %v2951_v51 = vpop.eup %2950  ;;  %v2188_v28 = vsel %vm2156_vm5, %v2140_v49, 0.0  ;;  %v1998_v30 = vmul.f32 0.6931472, %v2949_v44  ;;  %v2046_v5 = vadd.s32 168, %v3573_v27 }
 0x3e1   : > { %v2953_v0 = vpop.eup %2952  ;;  %v1760_v54 = vadd.f32 1.0, %v2951_v51  ;;  %vm2111_vm8 = vcmp.lt.s32.totalorder %v2077_v42, %v3710_v41  ;;  %v2189_v31 = vadd.f32 %v2188_v28, %v2187_v23  ;;  %v2190_v10 = vsel %vm2156_vm5, %v2141_v26, 0.0 }
 0x3e2   : > { %v1950_v2 = vadd.f32 0.005, %v1918_v17  ;;  %v2955_v1 = vpop.eup %2954  ;;  %v2192_v6 = vsel %vm2156_vm5, %v2142_v62, 0.0  ;;  %v2000_v35 = vmul.f32 0.6931472, %v2953_v0  ;;  %v2047_v4 = vadd.s32 176, %v3573_v27 }
 0x3e3   : > { %v2957_v48 = vpop.eup %2956  ;;  %2972 = vrcp.f32 %v1760_v54  ;;  %v1761_v33 = vadd.f32 1.0, %v2955_v1  ;;  %v2191_v11 = vadd.f32 %v2190_v10, %v2189_v31  ;;  %vm2112_vm9 = vcmp.lt.s32.totalorder %v2078_v12, %v3710_v41 }
 0x3e4   : > { %v2959_v46 = vpop.eup %2958  ;;  %2974 = vlog2.f32 %v1950_v2  ;;  %v2079_v39 = vadd.s32 %v3699_v53, %v2046_v5  ;;  %v2143_v40 = vsel %vm2111_vm8, %v1998_v30, 0.0  ;;  %v2002_v29 = vmul.f32 0.6931472, %v2957_v48 }
 0x3e5   : > { %v1854_v8 = vmul.f32 %v2959_v46, %v3713_v13  ;;  %2976 = vrcp.f32 %v1761_v33  ;;  %v2193_v9 = vadd.f32 %v2192_v6, %v2191_v11  ;;  %v2080_v18 = vadd.s32 %v3699_v53, %v2047_v4 }
 0x3e6   : > { %v2961_v45 = vpop.eup %2960  ;;  %v2144_v19 = vsel %vm2112_vm9, %v2000_v35, 0.0  ;;  %v2194_v63 = vsel %vm2156_vm5, %v2143_v40, 0.0  ;;  %vm2113_vm10 = vcmp.lt.s32.totalorder %v2079_v39, %v3710_v41  ;;  %v2048_v55 = vadd.s32 184, %v3573_v27 }
 0x3e7   : > { %v2963_v59 = vpop.eup %2962  ;;  %v1887_v60 = vadd.f32 %v3715_v37, %v1854_v8  ;;  %v2195_v61 = vadd.f32 %v2194_v63, %v2193_v9  ;;  %v2196_v52 = vsel %vm2156_vm5, %v2144_v19, 0.0  ;;  %v2004_v43 = vmul.f32 0.6931472, %v2961_v45 }
 0x3e8   : > { %v2965_v38 = vpop.eup %2964  ;;  %v1762_v16 = vadd.f32 1.0, %v2963_v59  ;;  %vm2114_vm11 = vcmp.lt.s32.totalorder %v2080_v18, %v3710_v41  ;;  %v2145_v25 = vsel %vm2113_vm10, %v2002_v29, 0.0  ;;  %v2081_v17 = vadd.s32 %v3699_v53, %v2048_v55 }
 0x3e9   : > { %v2967_v15 = vpop.eup %2966  ;;  %v1855_v24 = vmul.f32 %v2965_v38, %v3713_v13  ;;  %v1919_v20 = vmul.f32 0.99, %v1887_v60  ;;  %v2197_v44 = vadd.f32 %v2196_v52, %v2195_v61  ;;  %v2146_v23 = vsel %vm2114_vm11, %v2004_v43, 0.0 }
 0x3ea   : > { %v2969_v32 = vpop.eup %2968  ;;  %2978 = vrcp.f32 %v1762_v16  ;;  %v1856_v50 = vmul.f32 %v2967_v15, %v3713_v13  ;;  %v2198_v2 = vsel %vm2156_vm5, %v2145_v25, 0.0  ;;  %v2049_v1 = vadd.s32 192, %v3573_v27 }
 0x3eb   : > { %v1857_v34 = vmul.f32 %v2969_v32, %v3713_v13  ;;  %v1888_v47 = vadd.f32 %v3715_v37, %v1855_v24  ;;  %v1951_v22 = vadd.f32 0.005, %v1919_v20  ;;  %v2199_v30 = vadd.f32 %v2198_v2, %v2197_v44 }
 0x3ec   : > { %v2971_v21 = vpop.eup %2970  ;;  %v1889_v7 = vadd.f32 %v3715_v37, %v1856_v50  ;;  %v2200_v33 = vsel %vm2156_vm5, %v2146_v23, 0.0  ;;  %vm2115_vm12 = vcmp.lt.s32.totalorder %v2081_v17, %v3710_v41  ;;  %v2050_v46 = vadd.s32 200, %v3573_v27 }
 0x3ed   : > { %v1858_v36 = vmul.f32 %v2971_v21, %v3713_v13  ;;  %v1890_v3 = vadd.f32 %v3715_v37, %v1857_v34  ;;  %v1920_v56 = vmul.f32 0.99, %v1888_v47  ;;  %2980 = vlog2.f32 %v1951_v22 }
 0x3ee   : > { %v1921_v57 = vmul.f32 0.99, %v1889_v7  ;;  %v2051_v4 = vadd.s32 208, %v3573_v27  ;;  %v2052_v11 = vadd.s32 216, %v3573_v27  ;;  %v2082_v45 = vadd.s32 %v3699_v53, %v2049_v1 }
 0x3ef   : > { %v1891_v14 = vadd.f32 %v3715_v37, %v1858_v36  ;;  %v1922_v49 = vmul.f32 0.99, %v1890_v3  ;;  %v1952_v42 = vadd.f32 0.005, %v1920_v56  ;;  %v2201_v8 = vadd.f32 %v2200_v33, %v2199_v30 }
 0x3f0   : > { %v1953_v58 = vadd.f32 0.005, %v1921_v57  ;;  %v2973_v51 = vpop.eup %2972  ;;  %v2053_v38 = vadd.s32 224, %v3573_v27  ;;  %v2083_v15 = vadd.s32 %v3699_v53, %v2050_v46  ;;  %v2084_v29 = vadd.s32 %v3699_v53, %v2051_v4 }
 0x3f1   : > { %v1923_v26 = vmul.f32 0.99, %v1891_v14  ;;  %v1954_v62 = vadd.f32 0.005, %v1922_v49  ;;  %2982 = vlog2.f32 %v1952_v42  ;;  %v2975_v0 = vpop.eup %2974  ;;  %v1859_v54 = vmul.f32 %v2973_v51, %v3713_v13 }
 0x3f2   : > { %2984 = vlog2.f32 %v1953_v58  ;;  %v2977_v12 = vpop.eup %2976  ;;  %v2006_v48 = vmul.f32 0.6931472, %v2975_v0  ;;  %v2085_v18 = vadd.s32 %v3699_v53, %v2052_v11  ;;  %vm2116_vm13 = vcmp.lt.s32.totalorder %v2082_v45, %v3710_v41 }
 0x3f3   : > { %v1955_v28 = vadd.f32 0.005, %v1923_v26  ;;  %2986 = vlog2.f32 %v1954_v62  ;;  %v1860_v5 = vmul.f32 %v2977_v12, %v3713_v13  ;;  %v1892_v31 = vadd.f32 %v3715_v37, %v1859_v54 }
 0x3f4   : > { %v2147_v9 = vsel %vm2115_vm12, %v2006_v48, 0.0  ;;  %v2054_v20 = vadd.s32 232, %v3573_v27  ;;  %v2086_v34 = vadd.s32 %v3699_v53, %v2053_v38  ;;  %vm2117_vm14 = vcmp.lt.s32.totalorder %v2083_v15, %v3710_v41 }
 0x3f5   : > { %2988 = vlog2.f32 %v1955_v28  ;;  %v1893_v10 = vadd.f32 %v3715_v37, %v1860_v5  ;;  %v1924_v6 = vmul.f32 0.99, %v1892_v31  ;;  %vm2118_vm15 = vcmp.lt.s32.totalorder %v2084_v29, %v3710_v41 }
 0x3f6   : > { %vm2119_vm0 = vcmp.lt.s32.totalorder %v2085_v18, %v3710_v41  ;;  %v2055_v3 = vadd.s32 240, %v3573_v27  ;;  %v2087_v57 = vadd.s32 %v3699_v53, %v2054_v20  ;;  %vm2120_vm1 = vcmp.lt.s32.totalorder %v2086_v34, %v3710_v41 }
 0x3f7   : > { %v2979_v35 = vpop.eup %2978  ;;  %v1925_v39 = vmul.f32 0.99, %v1893_v10  ;;  %v1956_v40 = vadd.f32 0.005, %v1924_v6  ;;  %v2056_v17 = vadd.s32 248, %v3573_v27 }
 0x3f8   : > { %v1861_v59 = vmul.f32 %v2979_v35, %v3713_v13  ;;  %v2202_v13 = vsel %vm2156_vm5, %v2147_v9, 0.0  ;;  %v2088_v51 = vadd.s32 %v3699_v53, %v2055_v3  ;;  %vm2121_vm2 = vcmp.lt.s32.totalorder %v2087_v57, %v3710_v41 }
 0x3f9   : > { %v1957_v60 = vadd.f32 0.005, %v1925_v39  ;;  %2990 = vlog2.f32 %v1956_v40  ;;  %v2203_v50 = vadd.f32 %v2202_v13, %v2201_v8  ;;  %v2089_v1 = vadd.s32 %v3699_v53, %v2056_v17 }
 0x3fa   : > { %v1894_v16 = vadd.f32 %v3715_v37, %v1861_v59  ;;  %v2981_v24 = vpop.eup %2980  ;;  %vm2122_vm3 = vcmp.lt.s32.totalorder %v2088_v51, %v3710_v41 }
 0x3fb   : > { %v2008_v32 = vmul.f32 0.6931472, %v2981_v24  ;;  %2992 = vlog2.f32 %v1957_v60  ;;  %vm2123_vm4 = vcmp.lt.s32.totalorder %v2089_v1, %v3710_v41 }
 0x3fc   : > { %v1926_v19 = vmul.f32 0.99, %v1894_v16 }
 0x3fd   : > { %v2148_v47 = vsel %vm2116_vm13, %v2008_v32, 0.0 }
 0x3fe   : > { %v2983_v37 = vpop.eup %2982  ;;  %v1958_v63 = vadd.f32 0.005, %v1926_v19  ;;  %v2204_v7 = vsel %vm2156_vm5, %v2148_v47, 0.0 }
 0x3ff   : > { %v2985_v61 = vpop.eup %2984  ;;  %v2010_v21 = vmul.f32 0.6931472, %v2983_v37  ;;  %v2205_v52 = vadd.f32 %v2204_v7, %v2203_v50 }
 0x400   : > { %v2987_v22 = vpop.eup %2986  ;;  %v2012_v55 = vmul.f32 0.6931472, %v2985_v61  ;;  %2994 = vlog2.f32 %v1958_v63 }
 0x401   : > { %v2014_v36 = vmul.f32 0.6931472, %v2987_v22  ;;  %v2149_v56 = vsel %vm2117_vm14, %v2010_v21, 0.0 }
 0x402   : > { %v2989_v43 = vpop.eup %2988  ;;  %v2150_v25 = vsel %vm2118_vm15, %v2012_v55, 0.0  ;;  %v2206_v14 = vsel %vm2156_vm5, %v2149_v56, 0.0 }
 0x403   : > { %v2016_v49 = vmul.f32 0.6931472, %v2989_v43  ;;  %v2151_v42 = vsel %vm2119_vm0, %v2014_v36, 0.0  ;;  %v2207_v44 = vadd.f32 %v2206_v14, %v2205_v52  ;;  %v2208_v58 = vsel %vm2156_vm5, %v2150_v25, 0.0 }
 0x404   : > { %v2210_v23 = vsel %vm2156_vm5, %v2151_v42, 0.0 }
 0x405   : > { %v2152_v26 = vsel %vm2120_vm1, %v2016_v49, 0.0  ;;  %v2209_v62 = vadd.f32 %v2208_v58, %v2207_v44 }
 0x406   : > { %v2212_v0 = vsel %vm2156_vm5, %v2152_v26, 0.0  ;;  %v2991_v54 = vpop.eup %2990 }
 0x407   : > { %v2211_v2 = vadd.f32 %v2210_v23, %v2209_v62  ;;  %v2018_v12 = vmul.f32 0.6931472, %v2991_v54 }
 0x408   : > { %v2993_v28 = vpop.eup %2992 }
 0x409   : > { %v2213_v30 = vadd.f32 %v2212_v0, %v2211_v2  ;;  %v2020_v27 = vmul.f32 0.6931472, %v2993_v28  ;;  %v2153_v5 = vsel %vm2121_vm2, %v2018_v12, 0.0 }
 0x40a   : > { %v2214_v31 = vsel %vm2156_vm5, %v2153_v5, 0.0 }
 0x40b   : > { %v2154_v48 = vsel %vm2122_vm3, %v2020_v27, 0.0  ;;  %v2215_v33 = vadd.f32 %v2214_v31, %v2213_v30 }
 0x40c   : > { %v2216_v6 = vsel %vm2156_vm5, %v2154_v48, 0.0 }
 0x40d   : > { %v2995_v10 = vpop.eup %2994  ;;  %v2217_v35 = vadd.f32 %v2216_v6, %v2215_v33 }
 0x40e   : > { %v2022_v46 = vmul.f32 0.6931472, %v2995_v10 }
 0x410   : > { %v2155_v4 = vsel %vm2123_vm4, %v2022_v46, 0.0 }
 0x411   : > { %v2218_v53 = vsel %vm2156_vm5, %v2155_v4, 0.0 }
 0x412   : > { %v2219_v11 = vadd.f32 %v2218_v53, %v2217_v35 }
 0x414   : > { %2220 = vadd.xlane.f32.xlu1 %v2219_v11 }
 0x49d   : > { %v2221_v45 = vpop.xlane.xlu1 %2220 }
 0x49e   : > { %v2222_v8 = vrot.slane %v2221_v45, 4 }
 0x4a0   : > { %v2223_v59 = vadd.f32 %v2222_v8, %v2221_v45 }
 0x4a2   : > { %v2224_v39 = vrot.slane %v2223_v59, 2 }
 0x4a4   : > { %v2225_v40 = vadd.f32 %v2224_v39, %v2223_v59 }
 0x4a6   : > { %v2226_v9 = vrot.slane %v2225_v40, 1 }
 0x4a8   : > { %v2227_v38 = vadd.f32 %v2226_v9, %v2225_v40 }
 0x4aa   : > { %2612 = vpush %v2227_v38 }
 0x4db   : > { %s2613_s19 = spop %2612 }
 0x4dc   : > { %v2229_v41 = vstv %s2613_s19 }
 0x4dd   : > { %v2230_v16 = vsub.f32 0.0, %v2229_v41 }
 0x4df   : > { %2231 = vst [vmem:[%s373_s17] sm:$0xff] %v2230_v16 }
 0x4e0   : > { %3009 = shalt.err (!%p3006_p3)
}
 0x4e1   : > { %s3010_s12 = scalar_lea.hbm %s2244_s2, 128  ;;  %s3014_s15 = scalar_lea.hbm %s4111_s10, 256 }
 0x4e2   : > { %p3011_p4 = scmp.ne.s32.totalorder %s2244_s2, %s3010_s12  ;;  %p3015_p9 = scmp.lt.s32.totalorder %s2244_s2, %s4111_s10 }
 0x4e3   : > { %p3016_p10 = scmp.lt.s32.totalorder %s3014_s15, %s3010_s12 }
 0x4e4   : > { %p3012_p7 = pnand %p3011_p4, %p3167_p5 }
 0x4e5   : > { %p3017_p11 = por %p3016_p10, %p3015_p9 }
 0x4e6   : > { %p3013_p8 = pneg %p3012_p7 }
 0x4e8   : > { %p3018_p12 = pnand %p3017_p11, %p3013_p8 }
 0x4ea   : > { %3021 = shalt.err (!%p3018_p12)
}
 0x4eb   : > { %2614 = dma.vmem_to_hbm [thread:$0]  (%p3167_p5), %s2247_s18, 128, %s2244_s2, %s2233_s24  }
 0x4ec PF: > { %p2620_p13 = scmp.ge.s32.totalorder %s3056_s0, 2  ;;  %s2258_s19 = sand.u32 1, %s3044_s21  }
 0x4ed   : > { %s2259_s11 = scalar_lea.sflag [#allocation7], %s2258_s19 }
 0x4ee   : > { %p2617_p0 = pnand %p2620_p13, %p3171_p6 }
 0x4f0   : > { %p2618_p1 = pneg %p2617_p0 }
 0x4f2   : > { %3039 = dma.done.wait (%p2618_p1), %s2259_s11, 128  }
 0x4f3   : > { %3041 = vsyncadd (%p2618_p1), %s2259_s11, 4294967168  ;;  %p24_p2 = scmp.ge.s32.totalorder %s3154_s3, 4   ;;  %s4115_s21 = smov %s3048_s22 }
 0x4f4   : > { %s4116_s22 = smov %s3052_s23  ;;  %s4117_s23 = smov %s3165_s26 }
 0x4f5   : > { %s4118_s0 = smov %s3154_s3  ;;  %26 = sbr.rel (!%p24_p2) target bundleno = 8 (0x8), region = 98 }
 0x4fa   :  { %2264 = vsyncpa [#allocation7], 1 }
 0x4fb   :  { %2266 = vsyncpa [#allocation7 + $0x1], 1 }

</bundles_post_ra>
